<compile_context>
chip_gen: v7x
topology: tpu7x:2x2x1
jax: 0.10.0
libtpu: 0.0.40
codegen_flags: <defaults>
</compile_context>

<pallas_src>
import functools

import jax
import jax.numpy as jnp
from jax import lax
from jax.experimental import pallas as pl
from jax.experimental.pallas import tpu as pltpu


def _round_up(n, m):
    return ((n + m - 1) // m) * m


def rnn_fc_kernel(x_ref, *refs, num_layers, matmul_dtype):
    """Fused multi-layer tanh-RNN + final FC, layer-wavefront over time.

    refs = [w_ih_0, w_hh_0, b_0, ..., w_ih_{L-1}, w_hh_{L-1}, b_{L-1},
            w_fc, b_fc, out_ref, proj_ref]
    """
    L = num_layers
    w_ih_refs = [refs[3 * l + 0] for l in range(L)]
    w_hh_refs = [refs[3 * l + 1] for l in range(L)]
    b_refs = [refs[3 * l + 2] for l in range(L)]
    w_fc_ref = refs[3 * L]
    b_fc_ref = refs[3 * L + 1]
    out_ref = refs[3 * L + 2]
    proj_ref = refs[3 * L + 3]   # (T, B, H) f32 scratch: hoisted layer-0 input projection

    T, B, D = x_ref.shape
    H = proj_ref.shape[-1]

    # --- (1) Layer-0 input projection for ALL timesteps: one big MXU matmul, bias fused. ---
    x2d = x_ref[...].reshape(T * B, D)                       # already matmul_dtype from wrapper
    proj0 = jnp.dot(x2d, w_ih_refs[0][...],
                    preferred_element_type=jnp.float32) + b_refs[0][...]
    proj_ref[...] = proj0.reshape(T, B, H)

    # --- (2) Layer-wavefront recurrence: at loop step s, layer l handles timestep t = s - l. ---
    # All layers read only the PREVIOUS iteration's carries, so their MXU/EUP latencies overlap.
    total_steps = T + L - 1

    def step(s, carry):
        hs = list(carry)                                     # L x (B, H), matmul_dtype
        new_hs = []
        for l in range(L):
            t = s - l
            if l == 0:
                t0 = jnp.minimum(s, T - 1)                   # clamp epilogue reads (masked anyway)
                z = proj_ref[t0] + jnp.dot(hs[0], w_hh_refs[0][...],
                                           preferred_element_type=jnp.float32)
            else:
                # input projection for deeper layers uses the previous layer's carry, which is
                # exactly that layer's output one timestep behind in the wavefront.
                z = (jnp.dot(hs[l - 1], w_ih_refs[l][...],
                             preferred_element_type=jnp.float32)
                     + b_refs[l][...]
                     + jnp.dot(hs[l], w_hh_refs[l][...],
                               preferred_element_type=jnp.float32))
            # TODO(synk): on v6e/v7x a bf16 tanh here would halve the EUP share of the critical
            # path; kept f32 so the same kernel stays accurate on v5e (no bf16 EUP).
            h_new = jnp.tanh(z).astype(matmul_dtype)
            active = jnp.logical_and(t >= 0, t < T)          # wavefront ramp-up / ramp-down mask
            new_hs.append(jnp.where(active, h_new, hs[l]))
        return tuple(new_hs)

    init = tuple(jnp.zeros((B, H), matmul_dtype) for _ in range(L))
    unroll = True if total_steps <= 32 else 8                # bounded unroll: no vreg spills at large T
    carry = lax.fori_loop(0, total_steps, step, init, unroll=unroll)
    h_last = carry[L - 1]                                    # == out[:, -1, :] of the top layer

    # --- (3) Final FC; lane-dense (B, O_pad) unmasked store. ---
    out = jnp.dot(h_last, w_fc_ref[...], preferred_element_type=jnp.float32) + b_fc_ref[...]
    out_ref[...] = out.astype(out_ref.dtype)


def prepare_params(params, *, num_layers, matmul_dtype=jnp.bfloat16):
    """One-time weight prep: transpose to (in, out), pad to (8,128) tiles, cast, fuse biases.

    Done once (outside the per-call wrapper) so per-inference wall clock is just the kernel.
    """
    D = params["w_ih_0"].shape[1]
    H = params["w_hh_0"].shape[0]
    O = params["w_fc"].shape[0]
    D_pad, H_pad, O_pad = _round_up(D, 128), _round_up(H, 128), _round_up(O, 128)

    weights = []
    for l in range(num_layers):
        d_in = D if l == 0 else H
        d_in_pad = D_pad if l == 0 else H_pad
        w_ih = jnp.pad(jnp.transpose(params[f"w_ih_{l}"]),
                       ((0, d_in_pad - d_in), (0, H_pad - H))).astype(matmul_dtype)
        w_hh = jnp.pad(jnp.transpose(params[f"w_hh_{l}"]),
                       ((0, H_pad - H), (0, H_pad - H))).astype(matmul_dtype)
        bias = (params[f"b_ih_{l}"] + params[f"b_hh_{l}"]).astype(jnp.float32)   # pre-fused
        bias = jnp.pad(bias, (0, H_pad - H)).reshape(1, H_pad)
        weights += [w_ih, w_hh, bias]

    w_fc = jnp.pad(jnp.transpose(params["w_fc"]),
                   ((0, H_pad - H), (0, O_pad - O))).astype(matmul_dtype)       # (H_pad, O_pad)
    b_fc = jnp.pad(params["b_fc"], (0, O_pad - O)).astype(jnp.float32).reshape(1, O_pad)
    weights += [w_fc, b_fc]

    return {"weights": tuple(weights),
            "dims": (D, H, O, D_pad, H_pad, O_pad),
            "num_layers": num_layers,
            "matmul_dtype": matmul_dtype}


def rnn_model_forward(x, prepared, *, batch_blocks=1):
    """x: (B, T, D) batch_first, like the PyTorch module. Returns (B, output_dim).

    batch_blocks > 1 shards the batch over a parallel grid axis (set 2 on v7x when B_pad >= 16
    to engage the second TensorCore; keep 1 on v5e/v6e — a serial grid just adds latency).
    """
    num_layers = prepared["num_layers"]
    matmul_dtype = prepared["matmul_dtype"]
    D, H, O, D_pad, H_pad, O_pad = prepared["dims"]
    B, T, D_in = x.shape
    assert D_in == D, (D_in, D)

    B_pad = _round_up(B, 8 * batch_blocks)       # each batch shard is a whole number of sublane tiles
    Bc = B_pad // batch_blocks

    # Time-major, zero-padded, matmul-dtype input (padded rows are independent & sliced off).
    x_tbd = jnp.pad(jnp.transpose(x, (1, 0, 2)),
                    ((0, 0), (0, B_pad - B), (0, D_pad - D))).astype(matmul_dtype)

    kernel_args = [x_tbd, *prepared["weights"]]

    in_specs = [pl.BlockSpec((T, Bc, D_pad), lambda b: (0, b, 0))]
    for w in prepared["weights"]:
        in_specs.append(pl.BlockSpec(w.shape, lambda b, _nd=w.ndim: (0,) * _nd))
    out_spec = pl.BlockSpec((Bc, O_pad), lambda b: (b, 0))

    # Scoped-VMEM budget: inputs (x2 double-buffer headroom) + output + proj scratch + slack.
    # v5e's scoped default is only 16 MiB; clamp at 64 MiB (v7x physical VMEM per core).
    est = 2 * sum(int(a.size) * a.dtype.itemsize for a in kernel_args)
    est += 2 * Bc * O_pad * 4 + T * Bc * H_pad * 4
    vmem_limit = int(min(max(est + (4 << 20), 32 << 20), 64 << 20))

    out_padded = pl.pallas_call(
        functools.partial(rnn_fc_kernel, num_layers=num_layers, matmul_dtype=matmul_dtype),
        out_shape=jax.ShapeDtypeStruct((B_pad, O_pad), jnp.float32),
        grid=(batch_blocks,),
        in_specs=in_specs,
        out_specs=out_spec,
        scratch_shapes=[
            pltpu.VMEM((T, Bc, H_pad), jnp.float32),   # single scratch slab: layer-0 projection
        ],
        compiler_params=pltpu.CompilerParams(
            dimension_semantics=("parallel",),
            vmem_limit_bytes=vmem_limit),
    )(*kernel_args)
    # TODO(synk): for very large T or H (v7x: 64 MiB VMEM/core), additionally tile the hoisted
    # projection / input over T-chunks instead of whole-T residency.
    return out_padded[:B, :O].astype(x.dtype)


def init_params(key, input_dim, hidden, num_layers, output_dim):
    """Deterministic synthetic init matching nn.RNN / nn.Linear parameter shapes."""
    params = {}
    bound = 1.0 / jnp.sqrt(hidden)
    for l in range(num_layers):
        d_in = input_dim if l == 0 else hidden
        key, k1, k2, k3, k4 = jax.random.split(key, 5)
        params[f"w_ih_{l}"] = jax.random.uniform(k1, (hidden, d_in), jnp.float32, -bound, bound)
        params[f"w_hh_{l}"] = jax.random.uniform(k2, (hidden, hidden), jnp.float32, -bound, bound)
        params[f"b_ih_{l}"] = jax.random.uniform(k3, (hidden,), jnp.float32, -bound, bound)
        params[f"b_hh_{l}"] = jax.random.uniform(k4, (hidden,), jnp.float32, -bound, bound)
    key, k1, k2 = jax.random.split(key, 3)
    params["w_fc"] = jax.random.uniform(k1, (output_dim, hidden), jnp.float32, -bound, bound)
    params["b_fc"] = jax.random.uniform(k2, (output_dim,), jnp.float32, -bound, bound)
    return params


def reference_forward(x, params, *, num_layers):
    """Pure-JAX reference of the PyTorch forward (for correctness check)."""
    B, T, D = x.shape
    H = params["w_hh_0"].shape[0]
    h = jnp.zeros((num_layers, B, H), jnp.float32)

    def step(h, x_t):
        inp = x_t
        new_h = []
        for l in range(num_layers):
            z = (inp @ params[f"w_ih_{l}"].T + params[f"b_ih_{l}"]
                 + h[l] @ params[f"w_hh_{l}"].T + params[f"b_hh_{l}"])
            h_l = jnp.tanh(z)
            new_h.append(h_l)
            inp = h_l
        return jnp.stack(new_h, 0), h_l

    h, outs = lax.scan(step, h, jnp.transpose(x, (1, 0, 2)))
    last = outs[-1]                                   # out[:, -1, :]
    return last @ params["w_fc"].T + params["b_fc"]


if __name__ == "__main__":
    # Small shapes: batch=2, seq=8, input_dim=16, hidden_layers=32, layer_dim=2, output_dim=4
    B, T, D, H, L, O = 2, 8, 16, 32, 2, 4

    key = jax.random.PRNGKey(0)
    key, kx = jax.random.split(key)
    x = jax.random.normal(kx, (B, T, D), jnp.float32)
    params = init_params(key, D, H, L, O)

    ref = reference_forward(x, params, num_layers=L)

    # Check 1: f32 MXU operands (bit-tight against the reference at this small H).
    prep_f32 = prepare_params(params, num_layers=L, matmul_dtype=jnp.float32)
    out = jax.block_until_ready(rnn_model_forward(x, prep_f32))
    assert out.shape == (B, O), out.shape
    assert jnp.allclose(out, ref, atol=1e-4, rtol=1e-4), (out, ref)

    # Check 2: default bf16 MXU operands (f32 accumulation / tanh) — the production path.
    prep_bf16 = prepare_params(params, num_layers=L)          # matmul_dtype defaults to bf16
    out_bf16 = jax.block_until_ready(rnn_model_forward(x, prep_bf16))
    assert out_bf16.shape == (B, O), out_bf16.shape
    assert jnp.allclose(out_bf16, ref, atol=1e-1, rtol=1e-1), (out_bf16, ref)  # loose: bf16 operands

    # Check 3: batch-sharded grid path (the v7x 2-TensorCore lever), validated tight at f32.
    B2 = 16
    key, kx2 = jax.random.split(key)
    x2 = jax.random.normal(kx2, (B2, T, D), jnp.float32)
    ref2 = reference_forward(x2, params, num_layers=L)
    out2 = jax.block_until_ready(rnn_model_forward(x2, prep_f32, batch_blocks=2))
    assert out2.shape == (B2, O), out2.shape
    assert jnp.allclose(out2, ref2, atol=1e-4, rtol=1e-4), (out2, ref2)

    print("KERNEL_OK")
</pallas_src>

<mosaic_0001>
module attributes {stable_mosaic.version = 11 : i64} {
  func.func @rnn_fc_kernel(%arg0: i32, %arg1: memref<8x8x128xf32, #tpu.memory_space<vmem>>, %arg2: memref<128x128xf32, #tpu.memory_space<vmem>>, %arg3: memref<128x128xf32, #tpu.memory_space<vmem>>, %arg4: memref<1x128xf32, #tpu.memory_space<vmem>>, %arg5: memref<128x128xf32, #tpu.memory_space<vmem>>, %arg6: memref<128x128xf32, #tpu.memory_space<vmem>>, %arg7: memref<1x128xf32, #tpu.memory_space<vmem>>, %arg8: memref<128x128xf32, #tpu.memory_space<vmem>>, %arg9: memref<1x128xf32, #tpu.memory_space<vmem>>, %arg10: memref<8x128xf32, #tpu.memory_space<vmem>>, %arg11: memref<8x8x128xf32, #tpu.memory_space<vmem>>) attributes {dimension_semantics = [#tpu.dimension_semantics<parallel>], iteration_bounds = array<i64: 1>, scalar_prefetch = 0 : i64, scratch_operands = 1 : i64, tpu.core_type = #tpu.core_type<tc>, window_params = [{transform_indices = @transform_0, window_bounds = array<i64: 8, 8, 128>}, {pipeline_mode = #tpu.pipeline_mode<synchronous>, transform_indices = @transform_1, window_bounds = array<i64: 128, 128>}, {pipeline_mode = #tpu.pipeline_mode<synchronous>, transform_indices = @transform_2, window_bounds = array<i64: 128, 128>}, {pipeline_mode = #tpu.pipeline_mode<synchronous>, transform_indices = @transform_3, window_bounds = array<i64: 1, 128>}, {pipeline_mode = #tpu.pipeline_mode<synchronous>, transform_indices = @transform_4, window_bounds = array<i64: 128, 128>}, {pipeline_mode = #tpu.pipeline_mode<synchronous>, transform_indices = @transform_5, window_bounds = array<i64: 128, 128>}, {pipeline_mode = #tpu.pipeline_mode<synchronous>, transform_indices = @transform_6, window_bounds = array<i64: 1, 128>}, {pipeline_mode = #tpu.pipeline_mode<synchronous>, transform_indices = @transform_7, window_bounds = array<i64: 128, 128>}, {pipeline_mode = #tpu.pipeline_mode<synchronous>, transform_indices = @transform_8, window_bounds = array<i64: 1, 128>}, {transform_indices = @transform_9, window_bounds = array<i64: 8, 128>}]} {
    %c0 = arith.constant 0 : index
    %c0_0 = arith.constant 0 : index
    %c0_1 = arith.constant 0 : index
    %0 = vector.load %arg1[%c0, %c0_0, %c0_1] : memref<8x8x128xf32, #tpu.memory_space<vmem>>, vector<8x8x128xf32>
    %1 = vector.shape_cast %0 : vector<8x8x128xf32> to vector<64x128xf32>
    %c0_2 = arith.constant 0 : index
    %c0_3 = arith.constant 0 : index
    %2 = vector.load %arg2[%c0_2, %c0_3] : memref<128x128xf32, #tpu.memory_space<vmem>>, vector<128x128xf32>
    %cst = arith.constant dense<0.000000e+00> : vector<64x128xf32>
    %3 = tpu.matmul %1, %2, %cst {dimension_numbers = #tpu.dot_dimension_numbers<[1], [0], [0], [1], [0, 0, 1, 1], [], []>} : vector<64x128xf32>, vector<128x128xf32>, vector<64x128xf32> -> vector<64x128xf32>
    %c0_4 = arith.constant 0 : index
    %c0_5 = arith.constant 0 : index
    %4 = vector.load %arg4[%c0_4, %c0_5] : memref<1x128xf32, #tpu.memory_space<vmem>>, vector<1x128xf32>
    %5 = vector.broadcast %4 : vector<1x128xf32> to vector<64x128xf32>
    %6 = arith.addf %3, %5 : vector<64x128xf32>
    %7 = vector.shape_cast %6 : vector<64x128xf32> to vector<8x8x128xf32>
    %c0_6 = arith.constant 0 : index
    %c0_7 = arith.constant 0 : index
    %c0_8 = arith.constant 0 : index
    %8 = vector.load %arg11[%c0_6, %c0_7, %c0_8] : memref<8x8x128xf32, #tpu.memory_space<vmem>>, vector<8x8x128xf32>
    tpu.vector_store %arg11[%c0_6, %c0_7, %c0_8], %7 {strides = array<i32>} : memref<8x8x128xf32, #tpu.memory_space<vmem>>, vector<8x8x128xf32>,
    %cst_9 = arith.constant 0.000000e+00 : f32
    %9 = vector.broadcast %cst_9 : f32 to vector<8x128xf32>
    %cst_10 = arith.constant 0.000000e+00 : f32
    %10 = vector.broadcast %cst_10 : f32 to vector<8x128xf32>
    %c0_i32 = arith.constant 0 : i32
    %c0_i32_11 = arith.constant 0 : i32
    %11 = arith.subi %c0_i32, %c0_i32_11 : i32
    %c7_i32 = arith.constant 7 : i32
    %12 = arith.minsi %c0_i32, %c7_i32 : i32
    %13 = arith.index_cast %12 : i32 to index
    %c0_12 = arith.constant 0 : index
    %c0_13 = arith.constant 0 : index
    %14 = vector.load %arg11[%13, %c0_12, %c0_13] : memref<8x8x128xf32, #tpu.memory_space<vmem>>, vector<1x8x128xf32>
    %15 = vector.shape_cast %14 : vector<1x8x128xf32> to vector<8x128xf32>
    %c0_14 = arith.constant 0 : index
    %c0_15 = arith.constant 0 : index
    %16 = vector.load %arg3[%c0_14, %c0_15] : memref<128x128xf32, #tpu.memory_space<vmem>>, vector<128x128xf32>
    %cst_16 = arith.constant dense<0.000000e+00> : vector<8x128xf32>
    %17 = tpu.matmul %9, %16, %cst_16 {dimension_numbers = #tpu.dot_dimension_numbers<[1], [0], [0], [1], [0, 0, 1, 1], [], []>} : vector<8x128xf32>, vector<128x128xf32>, vector<8x128xf32> -> vector<8x128xf32>
    %18 = arith.addf %15, %17 : vector<8x128xf32>
    %19 = math.tanh %18 : vector<8x128xf32>
    %c0_i32_17 = arith.constant 0 : i32
    %20 = arith.cmpi sge, %11, %c0_i32_17 : i32
    %c8_i32 = arith.constant 8 : i32
    %21 = arith.cmpi slt, %11, %c8_i32 : i32
    %22 = arith.andi %20, %21 : i1
    %23 = arith.select %22, %19, %9 : vector<8x128xf32>
    %c1_i32 = arith.constant 1 : i32
    %24 = arith.subi %c0_i32, %c1_i32 : i32
    %c0_18 = arith.constant 0 : index
    %c0_19 = arith.constant 0 : index
    %25 = vector.load %arg5[%c0_18, %c0_19] : memref<128x128xf32, #tpu.memory_space<vmem>>, vector<128x128xf32>
    %cst_20 = arith.constant dense<0.000000e+00> : vector<8x128xf32>
    %26 = tpu.matmul %9, %25, %cst_20 {dimension_numbers = #tpu.dot_dimension_numbers<[1], [0], [0], [1], [0, 0, 1, 1], [], []>} : vector<8x128xf32>, vector<128x128xf32>, vector<8x128xf32> -> vector<8x128xf32>
    %c0_21 = arith.constant 0 : index
    %c0_22 = arith.constant 0 : index
    %27 = vector.load %arg7[%c0_21, %c0_22] : memref<1x128xf32, #tpu.memory_space<vmem>>, vector<1x128xf32>
    %28 = vector.broadcast %27 : vector<1x128xf32> to vector<8x128xf32>
    %29 = arith.addf %26, %28 : vector<8x128xf32>
    %c0_23 = arith.constant 0 : index
    %c0_24 = arith.constant 0 : index
    %30 = vector.load %arg6[%c0_23, %c0_24] : memref<128x128xf32, #tpu.memory_space<vmem>>, vector<128x128xf32>
    %cst_25 = arith.constant dense<0.000000e+00> : vector<8x128xf32>
    %31 = tpu.matmul %10, %30, %cst_25 {dimension_numbers = #tpu.dot_dimension_numbers<[1], [0], [0], [1], [0, 0, 1, 1], [], []>} : vector<8x128xf32>, vector<128x128xf32>, vector<8x128xf32> -> vector<8x128xf32>
    %32 = arith.addf %29, %31 : vector<8x128xf32>
    %33 = math.tanh %32 : vector<8x128xf32>
    %c0_i32_26 = arith.constant 0 : i32
    %34 = arith.cmpi sge, %24, %c0_i32_26 : i32
    %c8_i32_27 = arith.constant 8 : i32
    %35 = arith.cmpi slt, %24, %c8_i32_27 : i32
    %36 = arith.andi %34, %35 : i1
    %37 = arith.select %36, %33, %10 : vector<8x128xf32>
    %c1_i32_28 = arith.constant 1 : i32
    %c0_i32_29 = arith.constant 0 : i32
    %38 = arith.subi %c1_i32_28, %c0_i32_29 : i32
    %c7_i32_30 = arith.constant 7 : i32
    %39 = arith.minsi %c1_i32_28, %c7_i32_30 : i32
    %40 = arith.index_cast %39 : i32 to index
    %c0_31 = arith.constant 0 : index
    %c0_32 = arith.constant 0 : index
    %41 = vector.load %arg11[%40, %c0_31, %c0_32] : memref<8x8x128xf32, #tpu.memory_space<vmem>>, vector<1x8x128xf32>
    %42 = vector.shape_cast %41 : vector<1x8x128xf32> to vector<8x128xf32>
    %c0_33 = arith.constant 0 : index
    %c0_34 = arith.constant 0 : index
    %43 = vector.load %arg3[%c0_33, %c0_34] : memref<128x128xf32, #tpu.memory_space<vmem>>, vector<128x128xf32>
    %cst_35 = arith.constant dense<0.000000e+00> : vector<8x128xf32>
    %44 = tpu.matmul %23, %43, %cst_35 {dimension_numbers = #tpu.dot_dimension_numbers<[1], [0], [0], [1], [0, 0, 1, 1], [], []>} : vector<8x128xf32>, vector<128x128xf32>, vector<8x128xf32> -> vector<8x128xf32>
    %45 = arith.addf %42, %44 : vector<8x128xf32>
    %46 = math.tanh %45 : vector<8x128xf32>
    %c0_i32_36 = arith.constant 0 : i32
    %47 = arith.cmpi sge, %38, %c0_i32_36 : i32
    %c8_i32_37 = arith.constant 8 : i32
    %48 = arith.cmpi slt, %38, %c8_i32_37 : i32
    %49 = arith.andi %47, %48 : i1
    %50 = arith.select %49, %46, %23 : vector<8x128xf32>
    %c1_i32_38 = arith.constant 1 : i32
    %51 = arith.subi %c1_i32_28, %c1_i32_38 : i32
    %c0_39 = arith.constant 0 : index
    %c0_40 = arith.constant 0 : index
    %52 = vector.load %arg5[%c0_39, %c0_40] : memref<128x128xf32, #tpu.memory_space<vmem>>, vector<128x128xf32>
    %cst_41 = arith.constant dense<0.000000e+00> : vector<8x128xf32>
    %53 = tpu.matmul %23, %52, %cst_41 {dimension_numbers = #tpu.dot_dimension_numbers<[1], [0], [0], [1], [0, 0, 1, 1], [], []>} : vector<8x128xf32>, vector<128x128xf32>, vector<8x128xf32> -> vector<8x128xf32>
    %c0_42 = arith.constant 0 : index
    %c0_43 = arith.constant 0 : index
    %54 = vector.load %arg7[%c0_42, %c0_43] : memref<1x128xf32, #tpu.memory_space<vmem>>, vector<1x128xf32>
    %55 = vector.broadcast %54 : vector<1x128xf32> to vector<8x128xf32>
    %56 = arith.addf %53, %55 : vector<8x128xf32>
    %c0_44 = arith.constant 0 : index
    %c0_45 = arith.constant 0 : index
    %57 = vector.load %arg6[%c0_44, %c0_45] : memref<128x128xf32, #tpu.memory_space<vmem>>, vector<128x128xf32>
    %cst_46 = arith.constant dense<0.000000e+00> : vector<8x128xf32>
    %58 = tpu.matmul %37, %57, %cst_46 {dimension_numbers = #tpu.dot_dimension_numbers<[1], [0], [0], [1], [0, 0, 1, 1], [], []>} : vector<8x128xf32>, vector<128x128xf32>, vector<8x128xf32> -> vector<8x128xf32>
    %59 = arith.addf %56, %58 : vector<8x128xf32>
    %60 = math.tanh %59 : vector<8x128xf32>
    %c0_i32_47 = arith.constant 0 : i32
    %61 = arith.cmpi sge, %51, %c0_i32_47 : i32
    %c8_i32_48 = arith.constant 8 : i32
    %62 = arith.cmpi slt, %51, %c8_i32_48 : i32
    %63 = arith.andi %61, %62 : i1
    %64 = arith.select %63, %60, %37 : vector<8x128xf32>
    %c2_i32 = arith.constant 2 : i32
    %c0_i32_49 = arith.constant 0 : i32
    %65 = arith.subi %c2_i32, %c0_i32_49 : i32
    %c7_i32_50 = arith.constant 7 : i32
    %66 = arith.minsi %c2_i32, %c7_i32_50 : i32
    %67 = arith.index_cast %66 : i32 to index
    %c0_51 = arith.constant 0 : index
    %c0_52 = arith.constant 0 : index
    %68 = vector.load %arg11[%67, %c0_51, %c0_52] : memref<8x8x128xf32, #tpu.memory_space<vmem>>, vector<1x8x128xf32>
    %69 = vector.shape_cast %68 : vector<1x8x128xf32> to vector<8x128xf32>
    %c0_53 = arith.constant 0 : index
    %c0_54 = arith.constant 0 : index
    %70 = vector.load %arg3[%c0_53, %c0_54] : memref<128x128xf32, #tpu.memory_space<vmem>>, vector<128x128xf32>
    %cst_55 = arith.constant dense<0.000000e+00> : vector<8x128xf32>
    %71 = tpu.matmul %50, %70, %cst_55 {dimension_numbers = #tpu.dot_dimension_numbers<[1], [0], [0], [1], [0, 0, 1, 1], [], []>} : vector<8x128xf32>, vector<128x128xf32>, vector<8x128xf32> -> vector<8x128xf32>
    %72 = arith.addf %69, %71 : vector<8x128xf32>
    %73 = math.tanh %72 : vector<8x128xf32>
    %c0_i32_56 = arith.constant 0 : i32
    %74 = arith.cmpi sge, %65, %c0_i32_56 : i32
    %c8_i32_57 = arith.constant 8 : i32
    %75 = arith.cmpi slt, %65, %c8_i32_57 : i32
    %76 = arith.andi %74, %75 : i1
    %77 = arith.select %76, %73, %50 : vector<8x128xf32>
    %c1_i32_58 = arith.constant 1 : i32
    %78 = arith.subi %c2_i32, %c1_i32_58 : i32
    %c0_59 = arith.constant 0 : index
    %c0_60 = arith.constant 0 : index
    %79 = vector.load %arg5[%c0_59, %c0_60] : memref<128x128xf32, #tpu.memory_space<vmem>>, vector<128x128xf32>
    %cst_61 = arith.constant dense<0.000000e+00> : vector<8x128xf32>
    %80 = tpu.matmul %50, %79, %cst_61 {dimension_numbers = #tpu.dot_dimension_numbers<[1], [0], [0], [1], [0, 0, 1, 1], [], []>} : vector<8x128xf32>, vector<128x128xf32>, vector<8x128xf32> -> vector<8x128xf32>
    %c0_62 = arith.constant 0 : index
    %c0_63 = arith.constant 0 : index
    %81 = vector.load %arg7[%c0_62, %c0_63] : memref<1x128xf32, #tpu.memory_space<vmem>>, vector<1x128xf32>
    %82 = vector.broadcast %81 : vector<1x128xf32> to vector<8x128xf32>
    %83 = arith.addf %80, %82 : vector<8x128xf32>
    %c0_64 = arith.constant 0 : index
    %c0_65 = arith.constant 0 : index
    %84 = vector.load %arg6[%c0_64, %c0_65] : memref<128x128xf32, #tpu.memory_space<vmem>>, vector<128x128xf32>
    %cst_66 = arith.constant dense<0.000000e+00> : vector<8x128xf32>
    %85 = tpu.matmul %64, %84, %cst_66 {dimension_numbers = #tpu.dot_dimension_numbers<[1], [0], [0], [1], [0, 0, 1, 1], [], []>} : vector<8x128xf32>, vector<128x128xf32>, vector<8x128xf32> -> vector<8x128xf32>
    %86 = arith.addf %83, %85 : vector<8x128xf32>
    %87 = math.tanh %86 : vector<8x128xf32>
    %c0_i32_67 = arith.constant 0 : i32
    %88 = arith.cmpi sge, %78, %c0_i32_67 : i32
    %c8_i32_68 = arith.constant 8 : i32
    %89 = arith.cmpi slt, %78, %c8_i32_68 : i32
    %90 = arith.andi %88, %89 : i1
    %91 = arith.select %90, %87, %64 : vector<8x128xf32>
    %c3_i32 = arith.constant 3 : i32
    %c0_i32_69 = arith.constant 0 : i32
    %92 = arith.subi %c3_i32, %c0_i32_69 : i32
    %c7_i32_70 = arith.constant 7 : i32
    %93 = arith.minsi %c3_i32, %c7_i32_70 : i32
    %94 = arith.index_cast %93 : i32 to index
    %c0_71 = arith.constant 0 : index
    %c0_72 = arith.constant 0 : index
    %95 = vector.load %arg11[%94, %c0_71, %c0_72] : memref<8x8x128xf32, #tpu.memory_space<vmem>>, vector<1x8x128xf32>
    %96 = vector.shape_cast %95 : vector<1x8x128xf32> to vector<8x128xf32>
    %c0_73 = arith.constant 0 : index
    %c0_74 = arith.constant 0 : index
    %97 = vector.load %arg3[%c0_73, %c0_74] : memref<128x128xf32, #tpu.memory_space<vmem>>, vector<128x128xf32>
    %cst_75 = arith.constant dense<0.000000e+00> : vector<8x128xf32>
    %98 = tpu.matmul %77, %97, %cst_75 {dimension_numbers = #tpu.dot_dimension_numbers<[1], [0], [0], [1], [0, 0, 1, 1], [], []>} : vector<8x128xf32>, vector<128x128xf32>, vector<8x128xf32> -> vector<8x128xf32>
    %99 = arith.addf %96, %98 : vector<8x128xf32>
    %100 = math.tanh %99 : vector<8x128xf32>
    %c0_i32_76 = arith.constant 0 : i32
    %101 = arith.cmpi sge, %92, %c0_i32_76 : i32
    %c8_i32_77 = arith.constant 8 : i32
    %102 = arith.cmpi slt, %92, %c8_i32_77 : i32
    %103 = arith.andi %101, %102 : i1
    %104 = arith.select %103, %100, %77 : vector<8x128xf32>
    %c1_i32_78 = arith.constant 1 : i32
    %105 = arith.subi %c3_i32, %c1_i32_78 : i32
    %c0_79 = arith.constant 0 : index
    %c0_80 = arith.constant 0 : index
    %106 = vector.load %arg5[%c0_79, %c0_80] : memref<128x128xf32, #tpu.memory_space<vmem>>, vector<128x128xf32>
    %cst_81 = arith.constant dense<0.000000e+00> : vector<8x128xf32>
    %107 = tpu.matmul %77, %106, %cst_81 {dimension_numbers = #tpu.dot_dimension_numbers<[1], [0], [0], [1], [0, 0, 1, 1], [], []>} : vector<8x128xf32>, vector<128x128xf32>, vector<8x128xf32> -> vector<8x128xf32>
    %c0_82 = arith.constant 0 : index
    %c0_83 = arith.constant 0 : index
    %108 = vector.load %arg7[%c0_82, %c0_83] : memref<1x128xf32, #tpu.memory_space<vmem>>, vector<1x128xf32>
    %109 = vector.broadcast %108 : vector<1x128xf32> to vector<8x128xf32>
    %110 = arith.addf %107, %109 : vector<8x128xf32>
    %c0_84 = arith.constant 0 : index
    %c0_85 = arith.constant 0 : index
    %111 = vector.load %arg6[%c0_84, %c0_85] : memref<128x128xf32, #tpu.memory_space<vmem>>, vector<128x128xf32>
    %cst_86 = arith.constant dense<0.000000e+00> : vector<8x128xf32>
    %112 = tpu.matmul %91, %111, %cst_86 {dimension_numbers = #tpu.dot_dimension_numbers<[1], [0], [0], [1], [0, 0, 1, 1], [], []>} : vector<8x128xf32>, vector<128x128xf32>, vector<8x128xf32> -> vector<8x128xf32>
    %113 = arith.addf %110, %112 : vector<8x128xf32>
    %114 = math.tanh %113 : vector<8x128xf32>
    %c0_i32_87 = arith.constant 0 : i32
    %115 = arith.cmpi sge, %105, %c0_i32_87 : i32
    %c8_i32_88 = arith.constant 8 : i32
    %116 = arith.cmpi slt, %105, %c8_i32_88 : i32
    %117 = arith.andi %115, %116 : i1
    %118 = arith.select %117, %114, %91 : vector<8x128xf32>
    %c4_i32 = arith.constant 4 : i32
    %c0_i32_89 = arith.constant 0 : i32
    %119 = arith.subi %c4_i32, %c0_i32_89 : i32
    %c7_i32_90 = arith.constant 7 : i32
    %120 = arith.minsi %c4_i32, %c7_i32_90 : i32
    %121 = arith.index_cast %120 : i32 to index
    %c0_91 = arith.constant 0 : index
    %c0_92 = arith.constant 0 : index
    %122 = vector.load %arg11[%121, %c0_91, %c0_92] : memref<8x8x128xf32, #tpu.memory_space<vmem>>, vector<1x8x128xf32>
    %123 = vector.shape_cast %122 : vector<1x8x128xf32> to vector<8x128xf32>
    %c0_93 = arith.constant 0 : index
    %c0_94 = arith.constant 0 : index
    %124 = vector.load %arg3[%c0_93, %c0_94] : memref<128x128xf32, #tpu.memory_space<vmem>>, vector<128x128xf32>
    %cst_95 = arith.constant dense<0.000000e+00> : vector<8x128xf32>
    %125 = tpu.matmul %104, %124, %cst_95 {dimension_numbers = #tpu.dot_dimension_numbers<[1], [0], [0], [1], [0, 0, 1, 1], [], []>} : vector<8x128xf32>, vector<128x128xf32>, vector<8x128xf32> -> vector<8x128xf32>
    %126 = arith.addf %123, %125 : vector<8x128xf32>
    %127 = math.tanh %126 : vector<8x128xf32>
    %c0_i32_96 = arith.constant 0 : i32
    %128 = arith.cmpi sge, %119, %c0_i32_96 : i32
    %c8_i32_97 = arith.constant 8 : i32
    %129 = arith.cmpi slt, %119, %c8_i32_97 : i32
    %130 = arith.andi %128, %129 : i1
    %131 = arith.select %130, %127, %104 : vector<8x128xf32>
    %c1_i32_98 = arith.constant 1 : i32
    %132 = arith.subi %c4_i32, %c1_i32_98 : i32
    %c0_99 = arith.constant 0 : index
    %c0_100 = arith.constant 0 : index
    %133 = vector.load %arg5[%c0_99, %c0_100] : memref<128x128xf32, #tpu.memory_space<vmem>>, vector<128x128xf32>
    %cst_101 = arith.constant dense<0.000000e+00> : vector<8x128xf32>
    %134 = tpu.matmul %104, %133, %cst_101 {dimension_numbers = #tpu.dot_dimension_numbers<[1], [0], [0], [1], [0, 0, 1, 1], [], []>} : vector<8x128xf32>, vector<128x128xf32>, vector<8x128xf32> -> vector<8x128xf32>
    %c0_102 = arith.constant 0 : index
    %c0_103 = arith.constant 0 : index
    %135 = vector.load %arg7[%c0_102, %c0_103] : memref<1x128xf32, #tpu.memory_space<vmem>>, vector<1x128xf32>
    %136 = vector.broadcast %135 : vector<1x128xf32> to vector<8x128xf32>
    %137 = arith.addf %134, %136 : vector<8x128xf32>
    %c0_104 = arith.constant 0 : index
    %c0_105 = arith.constant 0 : index
    %138 = vector.load %arg6[%c0_104, %c0_105] : memref<128x128xf32, #tpu.memory_space<vmem>>, vector<128x128xf32>
    %cst_106 = arith.constant dense<0.000000e+00> : vector<8x128xf32>
    %139 = tpu.matmul %118, %138, %cst_106 {dimension_numbers = #tpu.dot_dimension_numbers<[1], [0], [0], [1], [0, 0, 1, 1], [], []>} : vector<8x128xf32>, vector<128x128xf32>, vector<8x128xf32> -> vector<8x128xf32>
    %140 = arith.addf %137, %139 : vector<8x128xf32>
    %141 = math.tanh %140 : vector<8x128xf32>
    %c0_i32_107 = arith.constant 0 : i32
    %142 = arith.cmpi sge, %132, %c0_i32_107 : i32
    %c8_i32_108 = arith.constant 8 : i32
    %143 = arith.cmpi slt, %132, %c8_i32_108 : i32
    %144 = arith.andi %142, %143 : i1
    %145 = arith.select %144, %141, %118 : vector<8x128xf32>
    %c5_i32 = arith.constant 5 : i32
    %c0_i32_109 = arith.constant 0 : i32
    %146 = arith.subi %c5_i32, %c0_i32_109 : i32
    %c7_i32_110 = arith.constant 7 : i32
    %147 = arith.minsi %c5_i32, %c7_i32_110 : i32
    %148 = arith.index_cast %147 : i32 to index
    %c0_111 = arith.constant 0 : index
    %c0_112 = arith.constant 0 : index
    %149 = vector.load %arg11[%148, %c0_111, %c0_112] : memref<8x8x128xf32, #tpu.memory_space<vmem>>, vector<1x8x128xf32>
    %150 = vector.shape_cast %149 : vector<1x8x128xf32> to vector<8x128xf32>
    %c0_113 = arith.constant 0 : index
    %c0_114 = arith.constant 0 : index
    %151 = vector.load %arg3[%c0_113, %c0_114] : memref<128x128xf32, #tpu.memory_space<vmem>>, vector<128x128xf32>
    %cst_115 = arith.constant dense<0.000000e+00> : vector<8x128xf32>
    %152 = tpu.matmul %131, %151, %cst_115 {dimension_numbers = #tpu.dot_dimension_numbers<[1], [0], [0], [1], [0, 0, 1, 1], [], []>} : vector<8x128xf32>, vector<128x128xf32>, vector<8x128xf32> -> vector<8x128xf32>
    %153 = arith.addf %150, %152 : vector<8x128xf32>
    %154 = math.tanh %153 : vector<8x128xf32>
    %c0_i32_116 = arith.constant 0 : i32
    %155 = arith.cmpi sge, %146, %c0_i32_116 : i32
    %c8_i32_117 = arith.constant 8 : i32
    %156 = arith.cmpi slt, %146, %c8_i32_117 : i32
    %157 = arith.andi %155, %156 : i1
    %158 = arith.select %157, %154, %131 : vector<8x128xf32>
    %c1_i32_118 = arith.constant 1 : i32
    %159 = arith.subi %c5_i32, %c1_i32_118 : i32
    %c0_119 = arith.constant 0 : index
    %c0_120 = arith.constant 0 : index
    %160 = vector.load %arg5[%c0_119, %c0_120] : memref<128x128xf32, #tpu.memory_space<vmem>>, vector<128x128xf32>
    %cst_121 = arith.constant dense<0.000000e+00> : vector<8x128xf32>
    %161 = tpu.matmul %131, %160, %cst_121 {dimension_numbers = #tpu.dot_dimension_numbers<[1], [0], [0], [1], [0, 0, 1, 1], [], []>} : vector<8x128xf32>, vector<128x128xf32>, vector<8x128xf32> -> vector<8x128xf32>
    %c0_122 = arith.constant 0 : index
    %c0_123 = arith.constant 0 : index
    %162 = vector.load %arg7[%c0_122, %c0_123] : memref<1x128xf32, #tpu.memory_space<vmem>>, vector<1x128xf32>
    %163 = vector.broadcast %162 : vector<1x128xf32> to vector<8x128xf32>
    %164 = arith.addf %161, %163 : vector<8x128xf32>
    %c0_124 = arith.constant 0 : index
    %c0_125 = arith.constant 0 : index
    %165 = vector.load %arg6[%c0_124, %c0_125] : memref<128x128xf32, #tpu.memory_space<vmem>>, vector<128x128xf32>
    %cst_126 = arith.constant dense<0.000000e+00> : vector<8x128xf32>
    %166 = tpu.matmul %145, %165, %cst_126 {dimension_numbers = #tpu.dot_dimension_numbers<[1], [0], [0], [1], [0, 0, 1, 1], [], []>} : vector<8x128xf32>, vector<128x128xf32>, vector<8x128xf32> -> vector<8x128xf32>
    %167 = arith.addf %164, %166 : vector<8x128xf32>
    %168 = math.tanh %167 : vector<8x128xf32>
    %c0_i32_127 = arith.constant 0 : i32
    %169 = arith.cmpi sge, %159, %c0_i32_127 : i32
    %c8_i32_128 = arith.constant 8 : i32
    %170 = arith.cmpi slt, %159, %c8_i32_128 : i32
    %171 = arith.andi %169, %170 : i1
    %172 = arith.select %171, %168, %145 : vector<8x128xf32>
    %c6_i32 = arith.constant 6 : i32
    %c0_i32_129 = arith.constant 0 : i32
    %173 = arith.subi %c6_i32, %c0_i32_129 : i32
    %c7_i32_130 = arith.constant 7 : i32
    %174 = arith.minsi %c6_i32, %c7_i32_130 : i32
    %175 = arith.index_cast %174 : i32 to index
    %c0_131 = arith.constant 0 : index
    %c0_132 = arith.constant 0 : index
    %176 = vector.load %arg11[%175, %c0_131, %c0_132] : memref<8x8x128xf32, #tpu.memory_space<vmem>>, vector<1x8x128xf32>
    %177 = vector.shape_cast %176 : vector<1x8x128xf32> to vector<8x128xf32>
    %c0_133 = arith.constant 0 : index
    %c0_134 = arith.constant 0 : index
    %178 = vector.load %arg3[%c0_133, %c0_134] : memref<128x128xf32, #tpu.memory_space<vmem>>, vector<128x128xf32>
    %cst_135 = arith.constant dense<0.000000e+00> : vector<8x128xf32>
    %179 = tpu.matmul %158, %178, %cst_135 {dimension_numbers = #tpu.dot_dimension_numbers<[1], [0], [0], [1], [0, 0, 1, 1], [], []>} : vector<8x128xf32>, vector<128x128xf32>, vector<8x128xf32> -> vector<8x128xf32>
    %180 = arith.addf %177, %179 : vector<8x128xf32>
    %181 = math.tanh %180 : vector<8x128xf32>
    %c0_i32_136 = arith.constant 0 : i32
    %182 = arith.cmpi sge, %173, %c0_i32_136 : i32
    %c8_i32_137 = arith.constant 8 : i32
    %183 = arith.cmpi slt, %173, %c8_i32_137 : i32
    %184 = arith.andi %182, %183 : i1
    %185 = arith.select %184, %181, %158 : vector<8x128xf32>
    %c1_i32_138 = arith.constant 1 : i32
    %186 = arith.subi %c6_i32, %c1_i32_138 : i32
    %c0_139 = arith.constant 0 : index
    %c0_140 = arith.constant 0 : index
    %187 = vector.load %arg5[%c0_139, %c0_140] : memref<128x128xf32, #tpu.memory_space<vmem>>, vector<128x128xf32>
    %cst_141 = arith.constant dense<0.000000e+00> : vector<8x128xf32>
    %188 = tpu.matmul %158, %187, %cst_141 {dimension_numbers = #tpu.dot_dimension_numbers<[1], [0], [0], [1], [0, 0, 1, 1], [], []>} : vector<8x128xf32>, vector<128x128xf32>, vector<8x128xf32> -> vector<8x128xf32>
    %c0_142 = arith.constant 0 : index
    %c0_143 = arith.constant 0 : index
    %189 = vector.load %arg7[%c0_142, %c0_143] : memref<1x128xf32, #tpu.memory_space<vmem>>, vector<1x128xf32>
    %190 = vector.broadcast %189 : vector<1x128xf32> to vector<8x128xf32>
    %191 = arith.addf %188, %190 : vector<8x128xf32>
    %c0_144 = arith.constant 0 : index
    %c0_145 = arith.constant 0 : index
    %192 = vector.load %arg6[%c0_144, %c0_145] : memref<128x128xf32, #tpu.memory_space<vmem>>, vector<128x128xf32>
    %cst_146 = arith.constant dense<0.000000e+00> : vector<8x128xf32>
    %193 = tpu.matmul %172, %192, %cst_146 {dimension_numbers = #tpu.dot_dimension_numbers<[1], [0], [0], [1], [0, 0, 1, 1], [], []>} : vector<8x128xf32>, vector<128x128xf32>, vector<8x128xf32> -> vector<8x128xf32>
    %194 = arith.addf %191, %193 : vector<8x128xf32>
    %195 = math.tanh %194 : vector<8x128xf32>
    %c0_i32_147 = arith.constant 0 : i32
    %196 = arith.cmpi sge, %186, %c0_i32_147 : i32
    %c8_i32_148 = arith.constant 8 : i32
    %197 = arith.cmpi slt, %186, %c8_i32_148 : i32
    %198 = arith.andi %196, %197 : i1
    %199 = arith.select %198, %195, %172 : vector<8x128xf32>
    %c7_i32_149 = arith.constant 7 : i32
    %c0_i32_150 = arith.constant 0 : i32
    %200 = arith.subi %c7_i32_149, %c0_i32_150 : i32
    %c7_i32_151 = arith.constant 7 : i32
    %201 = arith.minsi %c7_i32_149, %c7_i32_151 : i32
    %202 = arith.index_cast %201 : i32 to index
    %c0_152 = arith.constant 0 : index
    %c0_153 = arith.constant 0 : index
    %203 = vector.load %arg11[%202, %c0_152, %c0_153] : memref<8x8x128xf32, #tpu.memory_space<vmem>>, vector<1x8x128xf32>
    %204 = vector.shape_cast %203 : vector<1x8x128xf32> to vector<8x128xf32>
    %c0_154 = arith.constant 0 : index
    %c0_155 = arith.constant 0 : index
    %205 = vector.load %arg3[%c0_154, %c0_155] : memref<128x128xf32, #tpu.memory_space<vmem>>, vector<128x128xf32>
    %cst_156 = arith.constant dense<0.000000e+00> : vector<8x128xf32>
    %206 = tpu.matmul %185, %205, %cst_156 {dimension_numbers = #tpu.dot_dimension_numbers<[1], [0], [0], [1], [0, 0, 1, 1], [], []>} : vector<8x128xf32>, vector<128x128xf32>, vector<8x128xf32> -> vector<8x128xf32>
    %207 = arith.addf %204, %206 : vector<8x128xf32>
    %208 = math.tanh %207 : vector<8x128xf32>
    %c0_i32_157 = arith.constant 0 : i32
    %209 = arith.cmpi sge, %200, %c0_i32_157 : i32
    %c8_i32_158 = arith.constant 8 : i32
    %210 = arith.cmpi slt, %200, %c8_i32_158 : i32
    %211 = arith.andi %209, %210 : i1
    %212 = arith.select %211, %208, %185 : vector<8x128xf32>
    %c1_i32_159 = arith.constant 1 : i32
    %213 = arith.subi %c7_i32_149, %c1_i32_159 : i32
    %c0_160 = arith.constant 0 : index
    %c0_161 = arith.constant 0 : index
    %214 = vector.load %arg5[%c0_160, %c0_161] : memref<128x128xf32, #tpu.memory_space<vmem>>, vector<128x128xf32>
    %cst_162 = arith.constant dense<0.000000e+00> : vector<8x128xf32>
    %215 = tpu.matmul %185, %214, %cst_162 {dimension_numbers = #tpu.dot_dimension_numbers<[1], [0], [0], [1], [0, 0, 1, 1], [], []>} : vector<8x128xf32>, vector<128x128xf32>, vector<8x128xf32> -> vector<8x128xf32>
    %c0_163 = arith.constant 0 : index
    %c0_164 = arith.constant 0 : index
    %216 = vector.load %arg7[%c0_163, %c0_164] : memref<1x128xf32, #tpu.memory_space<vmem>>, vector<1x128xf32>
    %217 = vector.broadcast %216 : vector<1x128xf32> to vector<8x128xf32>
    %218 = arith.addf %215, %217 : vector<8x128xf32>
    %c0_165 = arith.constant 0 : index
    %c0_166 = arith.constant 0 : index
    %219 = vector.load %arg6[%c0_165, %c0_166] : memref<128x128xf32, #tpu.memory_space<vmem>>, vector<128x128xf32>
    %cst_167 = arith.constant dense<0.000000e+00> : vector<8x128xf32>
    %220 = tpu.matmul %199, %219, %cst_167 {dimension_numbers = #tpu.dot_dimension_numbers<[1], [0], [0], [1], [0, 0, 1, 1], [], []>} : vector<8x128xf32>, vector<128x128xf32>, vector<8x128xf32> -> vector<8x128xf32>
    %221 = arith.addf %218, %220 : vector<8x128xf32>
    %222 = math.tanh %221 : vector<8x128xf32>
    %c0_i32_168 = arith.constant 0 : i32
    %223 = arith.cmpi sge, %213, %c0_i32_168 : i32
    %c8_i32_169 = arith.constant 8 : i32
    %224 = arith.cmpi slt, %213, %c8_i32_169 : i32
    %225 = arith.andi %223, %224 : i1
    %226 = arith.select %225, %222, %199 : vector<8x128xf32>
    %c8_i32_170 = arith.constant 8 : i32
    %c0_i32_171 = arith.constant 0 : i32
    %227 = arith.subi %c8_i32_170, %c0_i32_171 : i32
    %c7_i32_172 = arith.constant 7 : i32
    %228 = arith.minsi %c8_i32_170, %c7_i32_172 : i32
    %229 = arith.index_cast %228 : i32 to index
    %c0_173 = arith.constant 0 : index
    %c0_174 = arith.constant 0 : index
    %230 = vector.load %arg11[%229, %c0_173, %c0_174] : memref<8x8x128xf32, #tpu.memory_space<vmem>>, vector<1x8x128xf32>
    %231 = vector.shape_cast %230 : vector<1x8x128xf32> to vector<8x128xf32>
    %c0_175 = arith.constant 0 : index
    %c0_176 = arith.constant 0 : index
    %232 = vector.load %arg3[%c0_175, %c0_176] : memref<128x128xf32, #tpu.memory_space<vmem>>, vector<128x128xf32>
    %cst_177 = arith.constant dense<0.000000e+00> : vector<8x128xf32>
    %233 = tpu.matmul %212, %232, %cst_177 {dimension_numbers = #tpu.dot_dimension_numbers<[1], [0], [0], [1], [0, 0, 1, 1], [], []>} : vector<8x128xf32>, vector<128x128xf32>, vector<8x128xf32> -> vector<8x128xf32>
    %234 = arith.addf %231, %233 : vector<8x128xf32>
    %235 = math.tanh %234 : vector<8x128xf32>
    %c0_i32_178 = arith.constant 0 : i32
    %236 = arith.cmpi sge, %227, %c0_i32_178 : i32
    %c8_i32_179 = arith.constant 8 : i32
    %237 = arith.cmpi slt, %227, %c8_i32_179 : i32
    %238 = arith.andi %236, %237 : i1
    %239 = arith.select %238, %235, %212 : vector<8x128xf32>
    %c1_i32_180 = arith.constant 1 : i32
    %240 = arith.subi %c8_i32_170, %c1_i32_180 : i32
    %c0_181 = arith.constant 0 : index
    %c0_182 = arith.constant 0 : index
    %241 = vector.load %arg5[%c0_181, %c0_182] : memref<128x128xf32, #tpu.memory_space<vmem>>, vector<128x128xf32>
    %cst_183 = arith.constant dense<0.000000e+00> : vector<8x128xf32>
    %242 = tpu.matmul %212, %241, %cst_183 {dimension_numbers = #tpu.dot_dimension_numbers<[1], [0], [0], [1], [0, 0, 1, 1], [], []>} : vector<8x128xf32>, vector<128x128xf32>, vector<8x128xf32> -> vector<8x128xf32>
    %c0_184 = arith.constant 0 : index
    %c0_185 = arith.constant 0 : index
    %243 = vector.load %arg7[%c0_184, %c0_185] : memref<1x128xf32, #tpu.memory_space<vmem>>, vector<1x128xf32>
    %244 = vector.broadcast %243 : vector<1x128xf32> to vector<8x128xf32>
    %245 = arith.addf %242, %244 : vector<8x128xf32>
    %c0_186 = arith.constant 0 : index
    %c0_187 = arith.constant 0 : index
    %246 = vector.load %arg6[%c0_186, %c0_187] : memref<128x128xf32, #tpu.memory_space<vmem>>, vector<128x128xf32>
    %cst_188 = arith.constant dense<0.000000e+00> : vector<8x128xf32>
    %247 = tpu.matmul %226, %246, %cst_188 {dimension_numbers = #tpu.dot_dimension_numbers<[1], [0], [0], [1], [0, 0, 1, 1], [], []>} : vector<8x128xf32>, vector<128x128xf32>, vector<8x128xf32> -> vector<8x128xf32>
    %248 = arith.addf %245, %247 : vector<8x128xf32>
    %249 = math.tanh %248 : vector<8x128xf32>
    %c0_i32_189 = arith.constant 0 : i32
    %250 = arith.cmpi sge, %240, %c0_i32_189 : i32
    %c8_i32_190 = arith.constant 8 : i32
    %251 = arith.cmpi slt, %240, %c8_i32_190 : i32
    %252 = arith.andi %250, %251 : i1
    %253 = arith.select %252, %249, %226 : vector<8x128xf32>
    %c9_i32 = arith.constant 9 : i32
    %c0_191 = arith.constant 0 : index
    %c0_192 = arith.constant 0 : index
    %254 = vector.load %arg8[%c0_191, %c0_192] : memref<128x128xf32, #tpu.memory_space<vmem>>, vector<128x128xf32>
    %cst_193 = arith.constant dense<0.000000e+00> : vector<8x128xf32>
    %255 = tpu.matmul %253, %254, %cst_193 {dimension_numbers = #tpu.dot_dimension_numbers<[1], [0], [0], [1], [0, 0, 1, 1], [], []>} : vector<8x128xf32>, vector<128x128xf32>, vector<8x128xf32> -> vector<8x128xf32>
    %c0_194 = arith.constant 0 : index
    %c0_195 = arith.constant 0 : index
    %256 = vector.load %arg9[%c0_194, %c0_195] : memref<1x128xf32, #tpu.memory_space<vmem>>, vector<1x128xf32>
    %257 = vector.broadcast %256 : vector<1x128xf32> to vector<8x128xf32>
    %258 = arith.addf %255, %257 : vector<8x128xf32>
    %c0_196 = arith.constant 0 : index
    %c0_197 = arith.constant 0 : index
    %259 = vector.load %arg10[%c0_196, %c0_197] : memref<8x128xf32, #tpu.memory_space<vmem>>, vector<8x128xf32>
    tpu.vector_store %arg10[%c0_196, %c0_197], %258 {strides = array<i32>} : memref<8x128xf32, #tpu.memory_space<vmem>>, vector<8x128xf32>,
    return
  }
  func.func @transform_0(%arg0: i32) -> (i32, i32, i32) {
    %c0_i32 = arith.constant 0 : i32
    %c0_i32_0 = arith.constant 0 : i32
    %c0_i32_1 = arith.constant 0 : i32
    return %c0_i32, %arg0, %c0_i32_0 : i32, i32, i32
  }
  func.func @transform_1(%arg0: i32) -> (i32, i32) {
    %c0_i32 = arith.constant 0 : i32
    %c0_i32_0 = arith.constant 0 : i32
    %c0_i32_1 = arith.constant 0 : i32
    return %c0_i32, %c0_i32_0 : i32, i32
  }
  func.func @transform_2(%arg0: i32) -> (i32, i32) {
    %c0_i32 = arith.constant 0 : i32
    %c0_i32_0 = arith.constant 0 : i32
    %c0_i32_1 = arith.constant 0 : i32
    return %c0_i32, %c0_i32_0 : i32, i32
  }
  func.func @transform_3(%arg0: i32) -> (i32, i32) {
    %c0_i32 = arith.constant 0 : i32
    %c0_i32_0 = arith.constant 0 : i32
    %c0_i32_1 = arith.constant 0 : i32
    return %c0_i32, %c0_i32_0 : i32, i32
  }
  func.func @transform_4(%arg0: i32) -> (i32, i32) {
    %c0_i32 = arith.constant 0 : i32
    %c0_i32_0 = arith.constant 0 : i32
    %c0_i32_1 = arith.constant 0 : i32
    return %c0_i32, %c0_i32_0 : i32, i32
  }
  func.func @transform_5(%arg0: i32) -> (i32, i32) {
    %c0_i32 = arith.constant 0 : i32
    %c0_i32_0 = arith.constant 0 : i32
    %c0_i32_1 = arith.constant 0 : i32
    return %c0_i32, %c0_i32_0 : i32, i32
  }
  func.func @transform_6(%arg0: i32) -> (i32, i32) {
    %c0_i32 = arith.constant 0 : i32
    %c0_i32_0 = arith.constant 0 : i32
    %c0_i32_1 = arith.constant 0 : i32
    return %c0_i32, %c0_i32_0 : i32, i32
  }
  func.func @transform_7(%arg0: i32) -> (i32, i32) {
    %c0_i32 = arith.constant 0 : i32
    %c0_i32_0 = arith.constant 0 : i32
    %c0_i32_1 = arith.constant 0 : i32
    return %c0_i32, %c0_i32_0 : i32, i32
  }
  func.func @transform_8(%arg0: i32) -> (i32, i32) {
    %c0_i32 = arith.constant 0 : i32
    %c0_i32_0 = arith.constant 0 : i32
    %c0_i32_1 = arith.constant 0 : i32
    return %c0_i32, %c0_i32_0 : i32, i32
  }
  func.func @transform_9(%arg0: i32) -> (i32, i32) {
    %c0_i32 = arith.constant 0 : i32
    %c0_i32_0 = arith.constant 0 : i32
    return %arg0, %c0_i32 : i32, i32
  }
}

</mosaic_0001>

<bundles_post_ra>
// kernel: tpu_custom_call.1
= control target key start
LH: loop header
LB: loop body
LE: loop exit
PB: predicated region body
PF: predicated region fallthrough
CT: control target
= control target key end

     0   :  { %14 = vsyncpa [#allocation4], 0  ;;  %s5115_s0 = inlined_call_operand.hbm [shape: f32[8,8,128], index: 0, kind: input, shape index: {}]   ;;  %s5116_s1 = inlined_call_operand.hbm [shape: f32[128,128], index: 1, kind: input, shape index: {}]   ;;  %s5117_s2 = inlined_call_operand.hbm [shape: f32[128,128], index: 2, kind: input, shape index: {}]   ;;  %s5118_s3 = inlined_call_operand.vmem [shape: f32[1,128], index: 3, kind: input, shape index: {}]   ;;  %s5119_s4 = inlined_call_operand.hbm [shape: f32[128,128], index: 4, kind: input, shape index: {}]   ;;  %s5120_s5 = inlined_call_operand.hbm [shape: f32[128,128], index: 5, kind: input, shape index: {}]   ;;  %s5121_s6 = inlined_call_operand.vmem [shape: f32[1,128], index: 6, kind: input, shape index: {}]   ;;  %s5122_s7 = inlined_call_operand.hbm [shape: f32[128,128], index: 7, kind: input, shape index: {}]   ;;  %s5123_s8 = inlined_call_operand.vmem [shape: f32[1,128], index: 8, kind: input, shape index: {}]   ;;  %s5124_s9 = inlined_call_operand.hbm [shape: f32[8,128], index: 9, kind: output, shape index: {}]  }
   0x1   :  { %15 = vsyncpa [#allocation7], 0 }
   0x2   :  { %16 = vsyncpa [#allocation10], 0 }
   0x3   :  { %17 = vsyncpa [#allocation13], 0 }
   0x4   :  { %18 = vsyncpa [#allocation5], 0  ;;  %s4388_s30 = smov [#allocation6]   ;;  %s4389_s11 = smov [#allocation9]  }
   0x5   :  { %s36_s10 = sshll.u32 %s4388_s30, 4  ;;  %s62_s12 = sshll.u32 %s4389_s11, 4  ;;  %s37_s10 = int_to_ptr.vmem [resolvable:$true] %s36_s10  ;;  %s4450_s12 = int_to_ptr.vmem [resolvable:$true] %s62_s12 }
   0x6   :  { %s4224_s15 = scalar_lea.hbm %s5116_s1, 2048 }
   0x7   :  { %p4225_p0 = scmp.ne.s32.totalorder %s5116_s1, %s4224_s15  ;;  %p4228_p1 = scmp.lt.u32.totalorder %s4224_s15, %s5116_s1 }
   0x9   :  { %p4230_p2 = pnand %p4228_p1, %p4225_p0 }
   0xb   :  { %4233 = shalt.err (!%p4230_p2)
}
   0xc   :  { %s4234_s20 = scalar_lea.vmem %s37_s10, 2048  ;;  %p4239_p4 = scmp.lt.s32.totalorder %s37_s10, %s37_s10 }
   0xd   :  { %p4235_p3 = scmp.ne.s32.totalorder %s37_s10, %s4234_s20  ;;  %p4240_p5 = scmp.lt.s32.totalorder %s4234_s20, %s4234_s20 }
   0xf   :  { %p4241_p6 = por %p4240_p5, %p4239_p4 }
  0x11   :  { %p4242_p7 = pnand %p4241_p6, %p4235_p3 }
  0x13   :  { %4245 = shalt.err (!%p4242_p7)
}
  0x14   :  { %s4390_s21 = smov 128   ;;  %s4391_s22 = smov 8  }
  0x15   :  { %42 = dma.hbm_to_vmem [thread:$0]  %s5116_s1, 2048, %s37_s10, [#allocation7], %s4390_s21, %s4390_s21, %s4391_s22  }
  0x16   :  { %s4246_s27 = scalar_lea.hbm %s5119_s4, 2048 }
  0x17   :  { %p4247_p8 = scmp.ne.s32.totalorder %s5119_s4, %s4246_s27  ;;  %p4250_p9 = scmp.lt.u32.totalorder %s4246_s27, %s5119_s4 }
  0x19   :  { %p4252_p10 = pnand %p4250_p9, %p4247_p8 }
  0x1b   :  { %4255 = shalt.err (!%p4252_p10)
}
  0x1c   :  { %s4256_s13 = scalar_lea.vmem %s4450_s12, 2048  ;;  %p4261_p12 = scmp.lt.s32.totalorder %s4450_s12, %s4450_s12 }
  0x1d   :  { %p4257_p11 = scmp.ne.s32.totalorder %s4450_s12, %s4256_s13  ;;  %p4262_p13 = scmp.lt.s32.totalorder %s4256_s13, %s4256_s13 }
  0x1f   :  { %p4263_p0 = por %p4262_p13, %p4261_p12 }
  0x21   :  { %p4264_p1 = pnand %p4263_p0, %p4257_p11 }
  0x23   :  { %4267 = shalt.err (!%p4264_p1)
}
  0x24   :  { %68 = dma.hbm_to_vmem [thread:$0]  %s5119_s4, 2048, %s4450_s12, [#allocation10], %s4390_s21, %s4390_s21, %s4391_s22  }
  0x25   :  { %s4392_s14 = smov [#allocation3]   ;;  %s4393_s16 = smov [#allocation8]  }
  0x26   :  { %s24_s15 = sshll.u32 %s4392_s14, 4  ;;  %s48_s17 = sshll.u32 %s4393_s16, 4  ;;  %s25_s15 = int_to_ptr.vmem [resolvable:$true] %s24_s15  ;;  %s4487_s17 = int_to_ptr.vmem [resolvable:$true] %s48_s17 }
  0x27   :  { %s4268_s20 = scalar_lea.hbm %s5115_s0, 1024 }
  0x28   :  { %p4269_p2 = scmp.ne.s32.totalorder %s5115_s0, %s4268_s20  ;;  %p4272_p3 = scmp.lt.u32.totalorder %s4268_s20, %s5115_s0 }
  0x2a   :  { %p4274_p4 = pnand %p4272_p3, %p4269_p2 }
  0x2c   :  { %4277 = shalt.err (!%p4274_p4)
}
  0x2d   :  { %s4278_s4 = scalar_lea.vmem %s25_s15, 1024  ;;  %p4283_p6 = scmp.lt.s32.totalorder %s25_s15, %s25_s15 }
  0x2e   :  { %p4279_p5 = scmp.ne.s32.totalorder %s25_s15, %s4278_s4  ;;  %p4284_p7 = scmp.lt.s32.totalorder %s4278_s4, %s4278_s4 }
  0x30   :  { %p4285_p8 = por %p4284_p7, %p4283_p6 }
  0x32   :  { %p4286_p9 = pnand %p4285_p8, %p4279_p5 }
  0x34   :  { %4289 = shalt.err (!%p4286_p9)
}
  0x35   :  { %30 = dma.hbm_to_vmem [thread:$0]  %s5115_s0, 1024, %s25_s15, [#allocation4], %s4390_s21, %s4390_s21, %s4391_s22  }
  0x36   :  { %s4290_s30 = scalar_lea.hbm %s5117_s2, 2048 }
  0x37   :  { %p4291_p10 = scmp.ne.s32.totalorder %s5117_s2, %s4290_s30  ;;  %p4294_p11 = scmp.lt.u32.totalorder %s4290_s30, %s5117_s2 }
  0x39   :  { %p4296_p12 = pnand %p4294_p11, %p4291_p10 }
  0x3b   :  { %4299 = shalt.err (!%p4296_p12)
}
  0x3c   :  { %s4300_s14 = scalar_lea.vmem %s4487_s17, 2048  ;;  %p4305_p0 = scmp.lt.s32.totalorder %s4487_s17, %s4487_s17 }
  0x3d   :  { %p4301_p13 = scmp.ne.s32.totalorder %s4487_s17, %s4300_s14  ;;  %p4306_p1 = scmp.lt.s32.totalorder %s4300_s14, %s4300_s14 }
  0x3f   :  { %p4307_p2 = por %p4306_p1, %p4305_p0 }
  0x41   :  { %p4308_p3 = pnand %p4307_p2, %p4301_p13 }
  0x43   :  { %4311 = shalt.err (!%p4308_p3)
}
  0x44   :  { %54 = dma.hbm_to_vmem [thread:$0]  %s5117_s2, 2048, %s4487_s17, [#allocation7], %s4390_s21, %s4390_s21, %s4391_s22  }
  0x45   :  { %s4394_s16 = smov [#allocation11]   ;;  %s4395_s19 = smov [#allocation12]  }
  0x46   :  { %s74_s18 = sshll.u32 %s4394_s16, 4  ;;  %s88_s20 = sshll.u32 %s4395_s19, 4  ;;  %s75_s18 = int_to_ptr.vmem [resolvable:$true] %s74_s18  ;;  %s4524_s20 = int_to_ptr.vmem [resolvable:$true] %s88_s20 }
  0x47   :  { %s4312_s25 = scalar_lea.hbm %s5120_s5, 2048 }
  0x48   :  { %p4313_p4 = scmp.ne.s32.totalorder %s5120_s5, %s4312_s25  ;;  %p4316_p5 = scmp.lt.u32.totalorder %s4312_s25, %s5120_s5 }
  0x4a   :  { %p4318_p6 = pnand %p4316_p5, %p4313_p4 }
  0x4c   :  { %4321 = shalt.err (!%p4318_p6)
}
  0x4d   :  { %s4322_s2 = scalar_lea.vmem %s75_s18, 2048  ;;  %p4327_p8 = scmp.lt.s32.totalorder %s75_s18, %s75_s18 }
  0x4e   :  { %p4323_p7 = scmp.ne.s32.totalorder %s75_s18, %s4322_s2  ;;  %p4328_p9 = scmp.lt.s32.totalorder %s4322_s2, %s4322_s2 }
  0x50   :  { %p4329_p10 = por %p4328_p9, %p4327_p8 }
  0x52   :  { %p4330_p11 = pnand %p4329_p10, %p4323_p7 }
  0x54   :  { %4333 = shalt.err (!%p4330_p11)
}
  0x55   :  { %80 = dma.hbm_to_vmem [thread:$0]  %s5120_s5, 2048, %s75_s18, [#allocation10], %s4390_s21, %s4390_s21, %s4391_s22  }
  0x56   :  { %s4334_s11 = scalar_lea.hbm %s5122_s7, 2048 }
  0x57   :  { %p4335_p12 = scmp.ne.s32.totalorder %s5122_s7, %s4334_s11  ;;  %p4338_p13 = scmp.lt.u32.totalorder %s4334_s11, %s5122_s7 }
  0x59   :  { %p4340_p0 = pnand %p4338_p13, %p4335_p12 }
  0x5b   :  { %4343 = shalt.err (!%p4340_p0)
}
  0x5c   :  { %s4344_s0 = scalar_lea.vmem %s4524_s20, 2048  ;;  %p4349_p2 = scmp.lt.s32.totalorder %s4524_s20, %s4524_s20 }
  0x5d   :  { %p4345_p1 = scmp.ne.s32.totalorder %s4524_s20, %s4344_s0  ;;  %p4350_p3 = scmp.lt.s32.totalorder %s4344_s0, %s4344_s0 }
  0x5f   :  { %p4351_p4 = por %p4350_p3, %p4349_p2 }
  0x61   :  { %p4352_p5 = pnand %p4351_p4, %p4345_p1 }
  0x63   :  { %4355 = shalt.err (!%p4352_p5)
}
  0x64   :  { %94 = dma.hbm_to_vmem [thread:$0]  %s5122_s7, 2048, %s4524_s20, [#allocation13], %s4390_s21, %s4390_s21, %s4391_s22  }
  0x65   :  { %4378 = dma.done.wait [#allocation4], 1024  }
  0x66   :  { %4379 = vsyncadd [#allocation4], 4294966272 }
  0x67   :  { %4380 = dma.done.wait [#allocation7], 4096  }
  0x68   :  { %4381 = vsyncadd [#allocation7], 4294963200 }
  0x69   :  { %4382 = dma.done.wait [#allocation10], 4096  }
  0x6a   :  { %4383 = vsyncadd [#allocation10], 4294963200 }
  0x6b   :  { %4384 = dma.done.wait [#allocation13], 2048  }
  0x6c   :  { %4385 = vsyncadd [#allocation13], 4294965248  ;;  %v4396_v0 = vmov 0.0|0.0   ;;  %vm4397_vm0 = vmmov 0   ;;  %v4398_v1 = vmov 0.0   ;;  %v123_v2 = vld [vmem:[#allocation6] sm:$0xff] }
  0x6d   :  { %3556 = vmatprep.subr.bf16.mxu1 %v4396_v0  ;;  %2681 = vmatprep.mubr.msk.f32.mxu1 %vm4397_vm0, %v4398_v1  ;;  %v124_v3 = vld [vmem:[#allocation6 + $0x8] sm:$0xff]  ;;  %v260_v4 = vld [vmem:[#allocation8] sm:$0xff]  ;;  %v125_v7 = vld [vmem:[#allocation6 + $0x10] sm:$0xff]  ;;  %s4399_s18 = smov [#allocation14]  }
  0x6e   :  { %v3524_v5 = vpack.c.bf16 %v124_v3, %v123_v2  ;;  %v261_v6 = vld [vmem:[#allocation8 + $0x8] sm:$0xff]  ;;  %v126_v8 = vld [vmem:[#allocation6 + $0x18] sm:$0xff]  ;;  %v262_v11 = vld [vmem:[#allocation8 + $0x10] sm:$0xff]  ;;  %s2141_s19 = sshll.u32 %s4399_s18, 4  ;;  %s2142_s19 = int_to_ptr.vmem [resolvable:$true] %s2141_s19 }
  0x6f   :  { %v4564_v9 = vpack.c.bf16 %v261_v6, %v260_v4  ;;  %v3528_v10 = vpack.c.bf16 %v126_v8, %v125_v7  ;;  %v263_v12 = vld [vmem:[#allocation8 + $0x18] sm:$0xff]  ;;  %v127_v13 = vld [vmem:[#allocation6 + $0x20] sm:$0xff]  ;;  %v128_v14 = vld [vmem:[#allocation6 + $0x28] sm:$0xff]  ;;  %s4356_s20 = scalar_lea.vmem %s2142_s19, 128  ;;  %p4361_p7 = scmp.lt.s32.totalorder %s2142_s19, %s2142_s19 }
  0x70   :  { %3525 = vmatprep.subr.bf16.mxu0 %v3524_v5  ;;  %v4567_v15 = vpack.c.bf16 %v263_v12, %v262_v11  ;;  %v3532_v16 = vpack.c.bf16 %v128_v14, %v127_v13  ;;  %v264_v17 = vld [vmem:[#allocation8 + $0x20] sm:$0xff]  ;;  %v265_v18 = vld [vmem:[#allocation8 + $0x28] sm:$0xff]  ;;  %v129_v19 = vld [vmem:[#allocation6 + $0x30] sm:$0xff]  ;;  %p4357_p6 = scmp.ne.s32.totalorder %s2142_s19, %s4356_s20  ;;  %p4362_p8 = scmp.lt.s32.totalorder %s4356_s20, %s4356_s20 }
  0x71   :  { %3527 = vmatpush3.bf16.msra.mxu0 %v3524_v5  ;;  %3558 = vmatpush3.bf16.msra.mxu1 %v4564_v9  ;;  %v130_v20 = vld [vmem:[#allocation6 + $0x38] sm:$0xff]  ;;  %v4571_v21 = vpack.c.bf16 %v265_v18, %v264_v17  ;;  %v266_v23 = vld [vmem:[#allocation8 + $0x30] sm:$0xff]  ;;  %v131_v25 = vld [vmem:[#allocation6 + $0x40] sm:$0xff] }
  0x72   :  { %3529 = vmatprep.subr.bf16.mxu0 %v3528_v10  ;;  %3559 = vmatprep.subr.bf16.mxu1 %v4396_v0  ;;  %v3536_v22 = vpack.c.bf16 %v130_v20, %v129_v19  ;;  %v267_v24 = vld [vmem:[#allocation8 + $0x38] sm:$0xff]  ;;  %v132_v26 = vld [vmem:[#allocation6 + $0x48] sm:$0xff]  ;;  %v115_v27 = vld [vmem:[#allocation3] sm:$0xff]  ;;  %p4363_p9 = por %p4362_p8, %p4361_p7 }
  0x73   :  { %2637 = vmatprep.mubr.f32.mxu0 %v115_v27  ;;  %v4575_v28 = vpack.c.bf16 %v267_v24, %v266_v23  ;;  %v3540_v29 = vpack.c.bf16 %v132_v26, %v131_v25  ;;  %v268_v30 = vld [vmem:[#allocation8 + $0x40] sm:$0xff]  ;;  %v269_v31 = vld [vmem:[#allocation8 + $0x48] sm:$0xff]  ;;  %v133_v32 = vld [vmem:[#allocation6 + $0x50] sm:$0xff] }
  0x74   :  { %v134_v33 = vld [vmem:[#allocation6 + $0x58] sm:$0xff]  ;;  %v4579_v34 = vpack.c.bf16 %v269_v31, %v268_v30  ;;  %v270_v36 = vld [vmem:[#allocation8 + $0x50] sm:$0xff]  ;;  %v135_v38 = vld [vmem:[#allocation6 + $0x60] sm:$0xff]  ;;  %p4364_p10 = pnand %p4363_p9, %p4357_p6 }
  0x75   :  { %3531 = vmatpush3.bf16.msra.mxu0 %v3528_v10  ;;  %3561 = vmatpush3.bf16.msra.mxu1 %v4567_v15  ;;  %v3544_v35 = vpack.c.bf16 %v134_v33, %v133_v32  ;;  %v271_v37 = vld [vmem:[#allocation8 + $0x58] sm:$0xff]  ;;  %v136_v39 = vld [vmem:[#allocation6 + $0x68] sm:$0xff]  ;;  %v272_v42 = vld [vmem:[#allocation8 + $0x60] sm:$0xff] }
  0x76   :  { %3533 = vmatprep.subr.bf16.mxu0 %v3532_v16  ;;  %3562 = vmatprep.subr.bf16.mxu1 %v4396_v0  ;;  %v4583_v40 = vpack.c.bf16 %v271_v37, %v270_v36  ;;  %v3548_v41 = vpack.c.bf16 %v136_v39, %v135_v38  ;;  %v273_v43 = vld [vmem:[#allocation8 + $0x68] sm:$0xff]  ;;  %v137_v44 = vld [vmem:[#allocation6 + $0x70] sm:$0xff]  ;;  %v138_v45 = vld [vmem:[#allocation6 + $0x78] sm:$0xff] }
  0x77   :  { %v4587_v46 = vpack.c.bf16 %v273_v43, %v272_v42  ;;  %v3552_v47 = vpack.c.bf16 %v138_v45, %v137_v44  ;;  %v274_v48 = vld [vmem:[#allocation8 + $0x70] sm:$0xff]  ;;  %v275_v49 = vld [vmem:[#allocation8 + $0x78] sm:$0xff]  ;;  %v422_v51 = vld [vmem:[#allocation9] sm:$0xff] }
  0x78   :  { %v4591_v50 = vpack.c.bf16 %v275_v49, %v274_v48  ;;  %v423_v52 = vld [vmem:[#allocation9 + $0x8] sm:$0xff]  ;;  %v424_v55 = vld [vmem:[#allocation9 + $0x10] sm:$0xff]  ;;  %v425_v56 = vld [vmem:[#allocation9 + $0x18] sm:$0xff] }
  0x79   :  { %3535 = vmatpush3.bf16.msra.mxu0 %v3532_v16  ;;  %3564 = vmatpush3.bf16.msra.mxu1 %v4571_v21  ;;  %v116_v53 = vld [vmem:[#allocation3 + $0x8] sm:$0xff]  ;;  %v4595_v54 = vpack.c.bf16 %v423_v52, %v422_v51  ;;  %v4602_v57 = vpack.c.bf16 %v425_v56, %v424_v55  ;;  %v426_v58 = vld [vmem:[#allocation9 + $0x20] sm:$0xff]  ;;  %v428_v61 = vld [vmem:[#allocation9 + $0x30] sm:$0xff] }
  0x7a   :  { %3537 = vmatprep.subr.bf16.mxu0 %v3536_v22  ;;  %3565 = vmatprep.subr.bf16.mxu1 %v4396_v0  ;;  %v427_v59 = vld [vmem:[#allocation9 + $0x28] sm:$0xff]  ;;  %v429_v62 = vld [vmem:[#allocation9 + $0x38] sm:$0xff]  ;;  %v430_v2 = vld [vmem:[#allocation9 + $0x40] sm:$0xff] }
  0x7b   :  { %v4610_v60 = vpack.c.bf16 %v427_v59, %v426_v58  ;;  %v4616_v63 = vpack.c.bf16 %v429_v62, %v428_v61  ;;  %v431_v3 = vld [vmem:[#allocation9 + $0x48] sm:$0xff]  ;;  %v117_v5 = vld [vmem:[#allocation3 + $0x10] sm:$0xff]  ;;  %v433_v7 = vld [vmem:[#allocation9 + $0x58] sm:$0xff] }
  0x7c   :  { %v4632_v4 = vpack.c.bf16 %v431_v3, %v430_v2  ;;  %v432_v6 = vld [vmem:[#allocation9 + $0x50] sm:$0xff]  ;;  %v118_v8 = vld [vmem:[#allocation3 + $0x18] sm:$0xff]  ;;  %v119_v11 = vld [vmem:[#allocation3 + $0x20] sm:$0xff] }
  0x7d   :  { %3539 = vmatpush3.bf16.msra.mxu0 %v3536_v22  ;;  %3567 = vmatpush3.bf16.msra.mxu1 %v4575_v28  ;;  %v4636_v10 = vpack.c.bf16 %v433_v7, %v432_v6  ;;  %v120_v12 = vld [vmem:[#allocation3 + $0x28] sm:$0xff]  ;;  %v434_v13 = vld [vmem:[#allocation9 + $0x60] sm:$0xff]  ;;  %v121_v16 = vld [vmem:[#allocation3 + $0x30] sm:$0xff] }
  0x7e   :  { %3541 = vmatprep.subr.bf16.mxu0 %v3540_v29  ;;  %3568 = vmatprep.subr.bf16.mxu1 %v4396_v0  ;;  %v435_v14 = vld [vmem:[#allocation9 + $0x68] sm:$0xff]  ;;  %v436_v18 = vld [vmem:[#allocation9 + $0x70] sm:$0xff]  ;;  %v437_v19 = vld [vmem:[#allocation9 + $0x78] sm:$0xff] }
  0x7f   :  { %v4640_v17 = vpack.c.bf16 %v435_v14, %v434_v13  ;;  %v122_v20 = vld [vmem:[#allocation3 + $0x38] sm:$0xff]  ;;  %v4643_v22 = vpack.c.bf16 %v437_v19, %v436_v18  ;;  %v4653_v23 = vld [vmem:[%s5118_s3] ss:$0 sm:$0xff]  ;;  %v516_v32 = vld [vmem:[#allocation11 + $0x8] sm:$0xff] }
  0x80   :  { %v515_v31 = vld [vmem:[#allocation11] sm:$0xff]  ;;  %v518_v36 = vld [vmem:[#allocation11 + $0x18] sm:$0xff]  ;;  %v521_v43 = vld [vmem:[#allocation11 + $0x30] sm:$0xff] }
  0x81   :  { %3543 = vmatpush3.bf16.msra.mxu0 %v3540_v29  ;;  %3570 = vmatpush3.bf16.msra.mxu1 %v4579_v34  ;;  %v4658_v33 = vpack.c.bf16 %v516_v32, %v515_v31  ;;  %v519_v39 = vld [vmem:[#allocation11 + $0x20] sm:$0xff]  ;;  %v522_v44 = vld [vmem:[#allocation11 + $0x38] sm:$0xff]  ;;  %v524_v48 = vld [vmem:[#allocation11 + $0x48] sm:$0xff] }
  0x82   :  { %3545 = vmatprep.subr.bf16.mxu0 %v3544_v35  ;;  %3571 = vmatprep.subr.bf16.mxu1 %v4396_v0  ;;  %v4677_v45 = vpack.c.bf16 %v522_v44, %v521_v43  ;;  %v525_v51 = vld [vmem:[#allocation11 + $0x50] sm:$0xff]  ;;  %v526_v52 = vld [vmem:[#allocation11 + $0x58] sm:$0xff]  ;;  %v527_v55 = vld [vmem:[#allocation11 + $0x60] sm:$0xff] }
  0x83   :  { %v528_v56 = vld [vmem:[#allocation11 + $0x68] sm:$0xff]  ;;  %v529_v59 = vld [vmem:[#allocation11 + $0x70] sm:$0xff]  ;;  %v530_v61 = vld [vmem:[#allocation11 + $0x78] sm:$0xff] }
  0x84   :  { %v4695_v58 = vpack.c.bf16 %v528_v56, %v527_v55  ;;  %v4701_v62 = vpack.c.bf16 %v530_v61, %v529_v59 }
  0x85   :  { %3547 = vmatpush3.bf16.msra.mxu0 %v3544_v35  ;;  %3573 = vmatpush3.bf16.msra.mxu1 %v4583_v40  ;;  %v517_v35 = vld [vmem:[#allocation11 + $0x10] sm:$0xff] }
  0x86   :  { %3549 = vmatprep.subr.bf16.mxu0 %v3548_v41  ;;  %3574 = vmatprep.subr.bf16.mxu1 %v4396_v0  ;;  %v4661_v38 = vpack.c.bf16 %v518_v36, %v517_v35 }
  0x89   :  { %3551 = vmatpush3.bf16.msra.mxu0 %v3548_v41  ;;  %3576 = vmatpush3.bf16.msra.mxu1 %v4587_v46  ;;  %v520_v41 = vld [vmem:[#allocation11 + $0x28] sm:$0xff] }
  0x8a   :  { %3553 = vmatprep.subr.bf16.mxu0 %v3552_v47  ;;  %3577 = vmatprep.subr.bf16.mxu1 %v4396_v0  ;;  %v4671_v42 = vpack.c.bf16 %v520_v41, %v519_v39 }
  0x8d   :  { %3555 = vmatpush3.bf16.msra.mxu0 %v3552_v47  ;;  %3579 = vmatpush3.bf16.msra.mxu1 %v4591_v50  ;;  %v523_v47 = vld [vmem:[#allocation11 + $0x40] sm:$0xff] }
  0x8e   :  { %3604 = vmatprep.subr.bf16.mxu1 %v4396_v0  ;;  %3580 = vmatprep.subr.bf16.mxu0 %v4396_v0  ;;  %v4683_v49 = vpack.c.bf16 %v524_v48, %v523_v47 }
  0x90   :  { %2638 = vmatmul.mubr.f32.vlgmr.msra.gmra.mrb[0].mxu0 %v116_v53  ;;  %2682 = vmatmul.mubr.f32.vlgmr.msra.gmra.mrb[0].mxu1 %v4398_v1  ;;  %v4689_v53 = vpack.c.bf16 %v526_v52, %v525_v51 }
  0x91   :  { %3606 = vmatpush3.bf16.msra.mxu1 %v4595_v54  ;;  %3582 = vmatpush3.bf16.msra.mxu0 %v4564_v9 }
  0x92   :  { %3607 = vmatprep.subr.bf16.mxu1 %v4396_v0  ;;  %3583 = vmatprep.subr.bf16.mxu0 %v4396_v0 }
  0x93   :  { %2751 = vmatprep.mubr.msk.f32.mxu1 %vm4397_vm0, %v4398_v1  ;;  %2640 = vmatprep.mubr.f32.mxu0 %v117_v5 }
  0x94   :  { %2641 = vmatmul.mubr.f32.gmra.mrb[2].mxu0 %v118_v8 }
  0x95   :  { %3609 = vmatpush3.bf16.msra.mxu1 %v4602_v57  ;;  %3585 = vmatpush3.bf16.msra.mxu0 %v4567_v15 }
  0x96   :  { %3610 = vmatprep.subr.bf16.mxu1 %v4396_v0  ;;  %3586 = vmatprep.subr.bf16.mxu0 %v4396_v0 }
  0x97   :  { %2643 = vmatprep.mubr.f32.mxu0 %v119_v11 }
  0x98   :  { %2644 = vmatmul.mubr.f32.gmra.mrb[4].mxu0 %v120_v12 }
  0x99   :  { %3612 = vmatpush3.bf16.msra.mxu1 %v4610_v60  ;;  %3588 = vmatpush3.bf16.msra.mxu0 %v4571_v21 }
  0x9a   :  { %3613 = vmatprep.subr.bf16.mxu1 %v4396_v0  ;;  %3589 = vmatprep.subr.bf16.mxu0 %v4396_v0 }
  0x9b   :  { %2646 = vmatprep.mubr.f32.mxu0 %v121_v16 }
  0x9c   :  { %2647 = vmatmul.mubr.f32.gmra.mrb[6].mxu0 %v122_v20  ;;  %v4773_v20 = vld [vmem:[%s5121_s6] ss:$0 sm:$0xff] }
  0x9d   :  { %3615 = vmatpush3.bf16.msra.mxu1 %v4616_v63  ;;  %3591 = vmatpush3.bf16.msra.mxu0 %v4575_v28 }
  0x9e   :  { %3616 = vmatprep.subr.bf16.mxu1 %v4396_v0  ;;  %3592 = vmatprep.subr.bf16.mxu0 %v4396_v0 }
  0x9f   :  { %2716 = vmatprep.mubr.msk.f32.mxu0 %vm4397_vm0, %v4398_v1 }
  0xa1   :  { %3594 = vmatpush3.bf16.msra.mxu0 %v4579_v34  ;;  %3618 = vmatpush3.bf16.msra.mxu1 %v4632_v4 }
  0xa2   :  { %3595 = vmatprep.subr.bf16.mxu0 %v4396_v0  ;;  %3619 = vmatprep.subr.bf16.mxu1 %v4396_v0 }
  0xa5   :  { %3597 = vmatpush3.bf16.msra.mxu0 %v4583_v40  ;;  %3621 = vmatpush3.bf16.msra.mxu1 %v4636_v10 }
  0xa6   :  { %3598 = vmatprep.subr.bf16.mxu0 %v4396_v0  ;;  %3622 = vmatprep.subr.bf16.mxu1 %v4396_v0 }
  0xa9   :  { %3600 = vmatpush3.bf16.msra.mxu0 %v4587_v46  ;;  %3624 = vmatpush3.bf16.msra.mxu1 %v4640_v17 }
  0xaa   :  { %3601 = vmatprep.subr.bf16.mxu0 %v4396_v0  ;;  %3625 = vmatprep.subr.bf16.mxu1 %v4396_v0 }
  0xad   :  { %3603 = vmatpush3.bf16.msra.mxu0 %v4591_v50  ;;  %3627 = vmatpush3.bf16.msra.mxu1 %v4643_v22 }
  0xae   :  { %3652 = vmatprep.subr.bf16.mxu0 %v4396_v0  ;;  %3628 = vmatprep.subr.bf16.mxu1 %v4396_v0 }
 0x163   :  { %v4655_v24 = vpop.f32.mrb[0].mxu0  ;;  %v342_v25 = vpop.f32.mrb[0].mxu1 }
 0x164   :  { %v212_v26 = vpop.f32.mrb[1].mxu0  ;;  %v2683_v27 = vpop.f32.mrb[1].mxu1  ;;  %v218_v11 = vadd.f32 %v4655_v24, %v4653_v23 }
 0x165   :  { %v213_v29 = vadd.f32 %v4653_v23, %v212_v26 }
 0x167   :  { %v346_v30 = vadd.f32 %v342_v25, %v213_v29  ;;  %v4729_v2 = vpop.f32.mrb[2].mxu0 }
 0x168   :  { %v4731_v3 = vpop.f32.mrb[3].mxu0  ;;  %v228_v39 = vadd.f32 %v4729_v2, %v4653_v23 }
 0x169   :  { %4192 = vtanh.f32 %v346_v30  ;;  %v223_v26 = vadd.f32 %v4653_v23, %v4731_v3 }
 0x16b   :  { %v4733_v5 = vpop.f32.mrb[4].mxu0 }
 0x16c   :  { %v4735_v6 = vpop.f32.mrb[5].mxu0 }
 0x16d   :  { %v233_v56 = vadd.f32 %v4653_v23, %v4735_v6 }
 0x16f   :  { %v4737_v7 = vpop.f32.mrb[6].mxu0 }
 0x170   :  { %v4739_v8 = vpop.f32.mrb[7].mxu0 }
 0x173   :  { %v4193_v37 = vpop.eup %4192 }
 0x174   :  { %2717 = vmatmul.mubr.f32.vlgmr.msra.gmra.mrb[8].mxu0 %v4193_v37  ;;  %2752 = vmatmul.mubr.f32.vlgmr.msra.gmra.mrb[2].mxu1 %v4193_v37 }
 0x175   :  { %3630 = vmatpush3.bf16.msra.mxu1 %v4658_v33  ;;  %2786 = vmatprep.mubr.msk.f32.mxu1 %vm4397_vm0, %v4398_v1 }
 0x176   :  { %3631 = vmatprep.subr.bf16.mxu1 %v4396_v0  ;;  %3654 = vmatpush3.bf16.msra.mxu0 %v4564_v9 }
 0x177   :  { %3655 = vmatprep.subr.bf16.mxu0 %v4396_v0  ;;  %2821 = vmatprep.mubr.msk.f32.mxu0 %vm4397_vm0, %v4398_v1 }
 0x179   :  { %3633 = vmatpush3.bf16.msra.mxu1 %v4661_v38 }
 0x17a   :  { %3634 = vmatprep.subr.bf16.mxu1 %v4396_v0  ;;  %3657 = vmatpush3.bf16.msra.mxu0 %v4567_v15 }
 0x17b   :  { %3658 = vmatprep.subr.bf16.mxu0 %v4396_v0 }
 0x17d   :  { %3636 = vmatpush3.bf16.msra.mxu1 %v4671_v42 }
 0x17e   :  { %3637 = vmatprep.subr.bf16.mxu1 %v4396_v0  ;;  %3660 = vmatpush3.bf16.msra.mxu0 %v4571_v21 }
 0x17f   :  { %3661 = vmatprep.subr.bf16.mxu0 %v4396_v0 }
 0x181   :  { %3639 = vmatpush3.bf16.msra.mxu1 %v4677_v45 }
 0x182   :  { %3640 = vmatprep.subr.bf16.mxu1 %v4396_v0  ;;  %3663 = vmatpush3.bf16.msra.mxu0 %v4575_v28 }
 0x183   :  { %3664 = vmatprep.subr.bf16.mxu0 %v4396_v0 }
 0x185   :  { %3642 = vmatpush3.bf16.msra.mxu1 %v4683_v49 }
 0x186   :  { %3643 = vmatprep.subr.bf16.mxu1 %v4396_v0  ;;  %3666 = vmatpush3.bf16.msra.mxu0 %v4579_v34 }
 0x187   :  { %3667 = vmatprep.subr.bf16.mxu0 %v4396_v0 }
 0x189   :  { %3645 = vmatpush3.bf16.msra.mxu1 %v4689_v53 }
 0x18a   :  { %3646 = vmatprep.subr.bf16.mxu1 %v4396_v0  ;;  %3669 = vmatpush3.bf16.msra.mxu0 %v4583_v40 }
 0x18b   :  { %3670 = vmatprep.subr.bf16.mxu0 %v4396_v0 }
 0x18d   :  { %3648 = vmatpush3.bf16.msra.mxu1 %v4695_v58 }
 0x18e   :  { %3649 = vmatprep.subr.bf16.mxu1 %v4396_v0  ;;  %3672 = vmatpush3.bf16.msra.mxu0 %v4587_v46 }
 0x18f   :  { %3673 = vmatprep.subr.bf16.mxu0 %v4396_v0 }
 0x191   :  { %3651 = vmatpush3.bf16.msra.mxu1 %v4701_v62 }
 0x192   :  { %3675 = vmatpush3.bf16.msra.mxu0 %v4591_v50  ;;  %3724 = vmatprep.subr.bf16.mxu1 %v4396_v0 }
 0x193   :  { %3676 = vmatprep.subr.bf16.mxu0 %v4396_v0 }
 0x194   :  { %2787 = vmatmul.mubr.f32.vlgmr.msra.gmra.mrb[2].mxu1 %v4398_v1 }
 0x195   :  { %3726 = vmatpush3.bf16.msra.mxu1 %v4564_v9  ;;  %2926 = vmatprep.mubr.msk.f32.mxu1 %vm4397_vm0, %v4398_v1 }
 0x196   :  { %3727 = vmatprep.subr.bf16.mxu1 %v4396_v0 }
 0x199   :  { %3729 = vmatpush3.bf16.msra.mxu1 %v4567_v15 }
 0x19a   :  { %3730 = vmatprep.subr.bf16.mxu1 %v4396_v0 }
 0x19d   :  { %3732 = vmatpush3.bf16.msra.mxu1 %v4571_v21 }
 0x19e   :  { %3733 = vmatprep.subr.bf16.mxu1 %v4396_v0 }
 0x1a1   :  { %3735 = vmatpush3.bf16.msra.mxu1 %v4575_v28 }
 0x1a2   :  { %3736 = vmatprep.subr.bf16.mxu1 %v4396_v0 }
 0x1a5   :  { %3738 = vmatpush3.bf16.msra.mxu1 %v4579_v34 }
 0x1a6   :  { %3739 = vmatprep.subr.bf16.mxu1 %v4396_v0 }
 0x1a9   :  { %3741 = vmatpush3.bf16.msra.mxu1 %v4583_v40 }
 0x1aa   :  { %3742 = vmatprep.subr.bf16.mxu1 %v4396_v0 }
 0x1ad   :  { %3744 = vmatpush3.bf16.msra.mxu1 %v4587_v46 }
 0x1ae   :  { %3745 = vmatprep.subr.bf16.mxu1 %v4396_v0 }
 0x1b1   :  { %3747 = vmatpush3.bf16.msra.mxu1 %v4591_v50 }
 0x1b2   :  { %3748 = vmatprep.subr.bf16.mxu1 %v4396_v0 }
 0x247   :  { %v416_v12 = vpop.f32.mrb[8].mxu0 }
 0x248   :  { %v420_v13 = vadd.f32 %v416_v12, %v218_v11  ;;  %v2718_v14 = vpop.f32.mrb[9].mxu0 }
 0x249   :  { %v243_v14 = vadd.f32 %v4653_v23, %v4739_v8  ;;  %v2044_v8 = vld [vmem:[#allocation12 + $0x18] sm:$0xff] }
 0x24a   :  { %4194 = vtanh.f32 %v420_v13 }
 0x254   :  { %v4195_v16 = vpop.eup %4194 }
 0x255   :  { %2822 = vmatmul.mubr.f32.vlgmr.msra.gmra.mrb[10].mxu0 %v4195_v16 }
 0x256   :  { %3678 = vmatpush3.bf16.msra.mxu0 %v4595_v54  ;;  %2856 = vmatprep.mubr.msk.f32.mxu0 %vm4397_vm0, %v4398_v1 }
 0x257   :  { %3679 = vmatprep.subr.bf16.mxu0 %v4396_v0 }
 0x25a   :  { %3681 = vmatpush3.bf16.msra.mxu0 %v4602_v57 }
 0x25b   :  { %3682 = vmatprep.subr.bf16.mxu0 %v4396_v0 }
 0x25e   :  { %3684 = vmatpush3.bf16.msra.mxu0 %v4610_v60 }
 0x25f   :  { %3685 = vmatprep.subr.bf16.mxu0 %v4396_v0 }
 0x262   :  { %3687 = vmatpush3.bf16.msra.mxu0 %v4616_v63 }
 0x263   :  { %3688 = vmatprep.subr.bf16.mxu0 %v4396_v0 }
 0x266   :  { %3690 = vmatpush3.bf16.msra.mxu0 %v4632_v4 }
 0x267   :  { %v597_v18 = vpop.f32.mrb[2].mxu1  ;;  %3691 = vmatprep.subr.bf16.mxu0 %v4396_v0 }
 0x268   :  { %v2788_v19 = vpop.f32.mrb[3].mxu1  ;;  %v4156_v24 = vadd.f32 %v4773_v20, %v597_v18 }
 0x26a   :  { %3693 = vmatpush3.bf16.msra.mxu0 %v4636_v10  ;;  %4196 = vtanh.f32 %v4156_v24 }
 0x26b   :  { %3694 = vmatprep.subr.bf16.mxu0 %v4396_v0 }
 0x26e   :  { %3696 = vmatpush3.bf16.msra.mxu0 %v4640_v17 }
 0x26f   :  { %3697 = vmatprep.subr.bf16.mxu0 %v4396_v0 }
 0x272   :  { %3699 = vmatpush3.bf16.msra.mxu0 %v4643_v22 }
 0x273   :  { %3700 = vmatprep.subr.bf16.mxu0 %v4396_v0 }
 0x274   :  { %v4197_v25 = vpop.eup %4196 }
 0x275   :  { %2857 = vmatmul.mubr.f32.vlgmr.msra.gmra.mrb[12].mxu0 %v4195_v16 }
 0x276   :  { %3702 = vmatpush3.bf16.msra.mxu0 %v4658_v33  ;;  %2891 = vmatprep.mubr.msk.f32.mxu0 %vm4397_vm0, %v4398_v1 }
 0x277   :  { %3703 = vmatprep.subr.bf16.mxu0 %v4396_v0 }
 0x27a   :  { %3705 = vmatpush3.bf16.msra.mxu0 %v4661_v38 }
 0x27b   :  { %3706 = vmatprep.subr.bf16.mxu0 %v4396_v0 }
 0x27e   :  { %3708 = vmatpush3.bf16.msra.mxu0 %v4671_v42 }
 0x27f   :  { %3709 = vmatprep.subr.bf16.mxu0 %v4396_v0 }
 0x282   :  { %3711 = vmatpush3.bf16.msra.mxu0 %v4677_v45 }
 0x283   :  { %3712 = vmatprep.subr.bf16.mxu0 %v4396_v0 }
 0x286   :  { %3714 = vmatpush3.bf16.msra.mxu0 %v4683_v49 }
 0x287   :  { %3715 = vmatprep.subr.bf16.mxu0 %v4396_v0 }
 0x28a   :  { %3717 = vmatpush3.bf16.msra.mxu0 %v4689_v53 }
 0x28b   :  { %3718 = vmatprep.subr.bf16.mxu0 %v4396_v0 }
 0x28e   :  { %3720 = vmatpush3.bf16.msra.mxu0 %v4695_v58 }
 0x28f   :  { %3721 = vmatprep.subr.bf16.mxu0 %v4396_v0 }
 0x292   :  { %3723 = vmatpush3.bf16.msra.mxu0 %v4701_v62 }
 0x293   :  { %3796 = vmatprep.subr.bf16.mxu0 %v4396_v0 }
 0x295   :  { %2892 = vmatmul.mubr.f32.vlgmr.msra.gmra.mrb[12].mxu0 %v4197_v25 }
 0x296   :  { %3798 = vmatpush3.bf16.msra.mxu0 %v4564_v9  ;;  %3031 = vmatprep.mubr.msk.f32.mxu0 %vm4397_vm0, %v4398_v1 }
 0x297   :  { %3799 = vmatprep.subr.bf16.mxu0 %v4396_v0 }
 0x29a   :  { %3801 = vmatpush3.bf16.msra.mxu0 %v4567_v15 }
 0x29b   :  { %3802 = vmatprep.subr.bf16.mxu0 %v4396_v0 }
 0x29e   :  { %3804 = vmatpush3.bf16.msra.mxu0 %v4571_v21 }
 0x29f   :  { %3805 = vmatprep.subr.bf16.mxu0 %v4396_v0 }
 0x2a2   :  { %3807 = vmatpush3.bf16.msra.mxu0 %v4575_v28 }
 0x2a3   :  { %3808 = vmatprep.subr.bf16.mxu0 %v4396_v0 }
 0x2a6   :  { %3810 = vmatpush3.bf16.msra.mxu0 %v4579_v34 }
 0x2a7   :  { %3811 = vmatprep.subr.bf16.mxu0 %v4396_v0 }
 0x2aa   :  { %3813 = vmatpush3.bf16.msra.mxu0 %v4583_v40 }
 0x2ab   :  { %3814 = vmatprep.subr.bf16.mxu0 %v4396_v0 }
 0x2ae   :  { %3816 = vmatpush3.bf16.msra.mxu0 %v4587_v46 }
 0x2af   :  { %3817 = vmatprep.subr.bf16.mxu0 %v4396_v0 }
 0x2b2   :  { %3819 = vmatpush3.bf16.msra.mxu0 %v4591_v50 }
 0x2b3   :  { %3820 = vmatprep.subr.bf16.mxu0 %v4396_v0 }
 0x328   :  { %v671_v27 = vpop.f32.mrb[10].mxu0 }
 0x329   :  { %v675_v29 = vadd.f32 %v671_v27, %v223_v26  ;;  %v2823_v30 = vpop.f32.mrb[11].mxu0  ;;  %v2045_v26 = vld [vmem:[#allocation12 + $0x20] sm:$0xff]  ;;  %v2046_v27 = vld [vmem:[#allocation12 + $0x28] sm:$0xff] }
 0x32a   :  { %v2047_v30 = vld [vmem:[#allocation12 + $0x30] sm:$0xff] }
 0x32b   :  { %4198 = vtanh.f32 %v675_v29  ;;  %v4139_v29 = vpack.c.bf16 %v2046_v27, %v2045_v26 }
 0x335   :  { %v4199_v31 = vpop.eup %4198 }
 0x336   :  { %2927 = vmatmul.mubr.f32.vlgmr.msra.gmra.mrb[4].mxu1 %v4199_v31 }
 0x337   :  { %3750 = vmatpush3.bf16.msra.mxu1 %v4595_v54  ;;  %2961 = vmatprep.mubr.msk.f32.mxu1 %vm4397_vm0, %v4398_v1 }
 0x338   :  { %3751 = vmatprep.subr.bf16.mxu1 %v4396_v0 }
 0x33b   :  { %3753 = vmatpush3.bf16.msra.mxu1 %v4602_v57 }
 0x33c   :  { %3754 = vmatprep.subr.bf16.mxu1 %v4396_v0 }
 0x33f   :  { %3756 = vmatpush3.bf16.msra.mxu1 %v4610_v60 }
 0x340   :  { %3757 = vmatprep.subr.bf16.mxu1 %v4396_v0 }
 0x343   :  { %3759 = vmatpush3.bf16.msra.mxu1 %v4616_v63 }
 0x344   :  { %3760 = vmatprep.subr.bf16.mxu1 %v4396_v0 }
 0x347   :  { %3762 = vmatpush3.bf16.msra.mxu1 %v4632_v4 }
 0x348   :  { %3763 = vmatprep.subr.bf16.mxu1 %v4396_v0 }
 0x34b   :  { %3765 = vmatpush3.bf16.msra.mxu1 %v4636_v10 }
 0x34c   :  { %3766 = vmatprep.subr.bf16.mxu1 %v4396_v0 }
 0x34f   :  { %3768 = vmatpush3.bf16.msra.mxu1 %v4640_v17 }
 0x350   :  { %3769 = vmatprep.subr.bf16.mxu1 %v4396_v0 }
 0x353   :  { %3771 = vmatpush3.bf16.msra.mxu1 %v4643_v22 }
 0x354   :  { %3772 = vmatprep.subr.bf16.mxu1 %v4396_v0 }
 0x356   :  { %2962 = vmatmul.mubr.f32.vlgmr.msra.gmra.mrb[6].mxu1 %v4199_v31  ;;  %v2048_v31 = vld [vmem:[#allocation12 + $0x38] sm:$0xff] }
 0x357   :  { %3774 = vmatpush3.bf16.msra.mxu1 %v4658_v33  ;;  %2996 = vmatprep.mubr.msk.f32.mxu1 %vm4397_vm0, %v4398_v1 }
 0x358   :  { %3775 = vmatprep.subr.bf16.mxu1 %v4396_v0 }
 0x35b   :  { %3777 = vmatpush3.bf16.msra.mxu1 %v4661_v38 }
 0x35c   :  { %3778 = vmatprep.subr.bf16.mxu1 %v4396_v0 }
 0x35f   :  { %3780 = vmatpush3.bf16.msra.mxu1 %v4671_v42 }
 0x360   :  { %3781 = vmatprep.subr.bf16.mxu1 %v4396_v0 }
 0x363   :  { %3783 = vmatpush3.bf16.msra.mxu1 %v4677_v45 }
 0x364   :  { %3784 = vmatprep.subr.bf16.mxu1 %v4396_v0 }
 0x367   :  { %3786 = vmatpush3.bf16.msra.mxu1 %v4683_v49 }
 0x368   :  { %v813_v32 = vpop.f32.mrb[12].mxu0  ;;  %3787 = vmatprep.subr.bf16.mxu1 %v4396_v0 }
 0x369   :  { %v4157_v35 = vadd.f32 %v4773_v20, %v813_v32  ;;  %v2893_v36 = vpop.f32.mrb[13].mxu0  ;;  %v4142_v32 = vpack.c.bf16 %v2048_v31, %v2047_v30 }
 0x36a   :  { %v2050_v36 = vld [vmem:[#allocation12 + $0x48] sm:$0xff] }
 0x36b   :  { %4200 = vtanh.f32 %v4157_v35  ;;  %3789 = vmatpush3.bf16.msra.mxu1 %v4689_v53  ;;  %v2049_v35 = vld [vmem:[#allocation12 + $0x40] sm:$0xff] }
 0x36c   :  { %3790 = vmatprep.subr.bf16.mxu1 %v4396_v0 }
 0x36f   :  { %3792 = vmatpush3.bf16.msra.mxu1 %v4695_v58 }
 0x370   :  { %3793 = vmatprep.subr.bf16.mxu1 %v4396_v0 }
 0x373   :  { %3795 = vmatpush3.bf16.msra.mxu1 %v4701_v62 }
 0x374   :  { %3868 = vmatprep.subr.bf16.mxu1 %v4396_v0 }
 0x375   :  { %v4201_v37 = vpop.eup %4200 }
 0x376   :  { %2997 = vmatmul.mubr.f32.vlgmr.msra.gmra.mrb[6].mxu1 %v4201_v37  ;;  %v4145_v37 = vpack.c.bf16 %v2050_v36, %v2049_v35 }
 0x377   :  { %3870 = vmatpush3.bf16.msra.mxu1 %v4564_v9  ;;  %3136 = vmatprep.mubr.msk.f32.mxu1 %vm4397_vm0, %v4398_v1 }
 0x378   :  { %3871 = vmatprep.subr.bf16.mxu1 %v4396_v0 }
 0x37b   :  { %3873 = vmatpush3.bf16.msra.mxu1 %v4567_v15 }
 0x37c   :  { %3874 = vmatprep.subr.bf16.mxu1 %v4396_v0 }
 0x37f   :  { %3876 = vmatpush3.bf16.msra.mxu1 %v4571_v21 }
 0x380   :  { %3877 = vmatprep.subr.bf16.mxu1 %v4396_v0 }
 0x383   :  { %3879 = vmatpush3.bf16.msra.mxu1 %v4575_v28 }
 0x384   :  { %3880 = vmatprep.subr.bf16.mxu1 %v4396_v0 }
 0x387   :  { %3882 = vmatpush3.bf16.msra.mxu1 %v4579_v34 }
 0x388   :  { %3883 = vmatprep.subr.bf16.mxu1 %v4396_v0 }
 0x38b   :  { %3885 = vmatpush3.bf16.msra.mxu1 %v4583_v40 }
 0x38c   :  { %3886 = vmatprep.subr.bf16.mxu1 %v4396_v0 }
 0x38f   :  { %3888 = vmatpush3.bf16.msra.mxu1 %v4587_v46 }
 0x390   :  { %3889 = vmatprep.subr.bf16.mxu1 %v4396_v0 }
 0x393   :  { %3891 = vmatpush3.bf16.msra.mxu1 %v4591_v50 }
 0x394   :  { %3892 = vmatprep.subr.bf16.mxu1 %v4396_v0 }
 0x409   :  { %v887_v41 = vpop.f32.mrb[4].mxu1 }
 0x40a   :  { %v891_v43 = vadd.f32 %v887_v41, %v228_v39  ;;  %v2928_v44 = vpop.f32.mrb[5].mxu1  ;;  %v248_v39 = vadd.f32 %v4737_v7, %v4653_v23  ;;  %v2054_v7 = vld [vmem:[#allocation12 + $0x68] sm:$0xff] }
 0x40c   :  { %4202 = vtanh.f32 %v891_v43 }
 0x416   :  { %v4203_v47 = vpop.eup %4202 }
 0x417   :  { %3032 = vmatmul.mubr.f32.vlgmr.msra.gmra.mrb[14].mxu0 %v4203_v47 }
 0x418   :  { %3822 = vmatpush3.bf16.msra.mxu0 %v4595_v54  ;;  %3066 = vmatprep.mubr.msk.f32.mxu0 %vm4397_vm0, %v4398_v1 }
 0x419   :  { %3823 = vmatprep.subr.bf16.mxu0 %v4396_v0 }
 0x41c   :  { %3825 = vmatpush3.bf16.msra.mxu0 %v4602_v57 }
 0x41d   :  { %3826 = vmatprep.subr.bf16.mxu0 %v4396_v0 }
 0x420   :  { %3828 = vmatpush3.bf16.msra.mxu0 %v4610_v60 }
 0x421   :  { %3829 = vmatprep.subr.bf16.mxu0 %v4396_v0 }
 0x424   :  { %3831 = vmatpush3.bf16.msra.mxu0 %v4616_v63 }
 0x425   :  { %3832 = vmatprep.subr.bf16.mxu0 %v4396_v0 }
 0x428   :  { %3834 = vmatpush3.bf16.msra.mxu0 %v4632_v4 }
 0x429   :  { %3835 = vmatprep.subr.bf16.mxu0 %v4396_v0 }
 0x42c   :  { %3837 = vmatpush3.bf16.msra.mxu0 %v4636_v10 }
 0x42d   :  { %3838 = vmatprep.subr.bf16.mxu0 %v4396_v0 }
 0x430   :  { %3840 = vmatpush3.bf16.msra.mxu0 %v4640_v17 }
 0x431   :  { %3841 = vmatprep.subr.bf16.mxu0 %v4396_v0 }
 0x434   :  { %3843 = vmatpush3.bf16.msra.mxu0 %v4643_v22 }
 0x435   :  { %3844 = vmatprep.subr.bf16.mxu0 %v4396_v0 }
 0x437   :  { %3067 = vmatmul.mubr.f32.vlgmr.msra.gmra.mrb[16].mxu0 %v4203_v47 }
 0x438   :  { %3846 = vmatpush3.bf16.msra.mxu0 %v4658_v33  ;;  %3101 = vmatprep.mubr.msk.f32.mxu0 %vm4397_vm0, %v4398_v1 }
 0x439   :  { %3847 = vmatprep.subr.bf16.mxu0 %v4396_v0 }
 0x43c   :  { %3849 = vmatpush3.bf16.msra.mxu0 %v4661_v38 }
 0x43d   :  { %3850 = vmatprep.subr.bf16.mxu0 %v4396_v0 }
 0x440   :  { %3852 = vmatpush3.bf16.msra.mxu0 %v4671_v42 }
 0x441   :  { %3853 = vmatprep.subr.bf16.mxu0 %v4396_v0 }
 0x444   :  { %3855 = vmatpush3.bf16.msra.mxu0 %v4677_v45 }
 0x445   :  { %3856 = vmatprep.subr.bf16.mxu0 %v4396_v0 }
 0x448   :  { %3858 = vmatpush3.bf16.msra.mxu0 %v4683_v49 }
 0x449   :  { %v1029_v48 = vpop.f32.mrb[6].mxu1  ;;  %3859 = vmatprep.subr.bf16.mxu0 %v4396_v0 }
 0x44a   :  { %v4158_v51 = vadd.f32 %v4773_v20, %v1029_v48  ;;  %v2998_v52 = vpop.f32.mrb[7].mxu1  ;;  %v2055_v48 = vld [vmem:[#allocation12 + $0x70] sm:$0xff] }
 0x44c   :  { %4204 = vtanh.f32 %v4158_v51  ;;  %3861 = vmatpush3.bf16.msra.mxu0 %v4689_v53  ;;  %v2056_v51 = vld [vmem:[#allocation12 + $0x78] sm:$0xff] }
 0x44d   :  { %3862 = vmatprep.subr.bf16.mxu0 %v4396_v0 }
 0x450   :  { %3864 = vmatpush3.bf16.msra.mxu0 %v4695_v58 }
 0x451   :  { %3865 = vmatprep.subr.bf16.mxu0 %v4396_v0 }
 0x454   :  { %3867 = vmatpush3.bf16.msra.mxu0 %v4701_v62 }
 0x455   :  { %3940 = vmatprep.subr.bf16.mxu0 %v4396_v0 }
 0x456   :  { %v4205_v55 = vpop.eup %4204 }
 0x457   :  { %3102 = vmatmul.mubr.f32.vlgmr.msra.gmra.mrb[16].mxu0 %v4205_v55 }
 0x458   :  { %3942 = vmatpush3.bf16.msra.mxu0 %v4564_v9  ;;  %3241 = vmatprep.mubr.msk.f32.mxu0 %vm4397_vm0, %v4398_v1 }
 0x459   :  { %3943 = vmatprep.subr.bf16.mxu0 %v4396_v0 }
 0x45c   :  { %3945 = vmatpush3.bf16.msra.mxu0 %v4567_v15 }
 0x45d   :  { %3946 = vmatprep.subr.bf16.mxu0 %v4396_v0 }
 0x460   :  { %3948 = vmatpush3.bf16.msra.mxu0 %v4571_v21 }
 0x461   :  { %3949 = vmatprep.subr.bf16.mxu0 %v4396_v0 }
 0x464   :  { %3951 = vmatpush3.bf16.msra.mxu0 %v4575_v28 }
 0x465   :  { %3952 = vmatprep.subr.bf16.mxu0 %v4396_v0 }
 0x468   :  { %3954 = vmatpush3.bf16.msra.mxu0 %v4579_v34 }
 0x469   :  { %3955 = vmatprep.subr.bf16.mxu0 %v4396_v0 }
 0x46c   :  { %3957 = vmatpush3.bf16.msra.mxu0 %v4583_v40 }
 0x46d   :  { %3958 = vmatprep.subr.bf16.mxu0 %v4396_v0 }
 0x470   :  { %3960 = vmatpush3.bf16.msra.mxu0 %v4587_v46 }
 0x471   :  { %3961 = vmatprep.subr.bf16.mxu0 %v4396_v0 }
 0x474   :  { %3963 = vmatpush3.bf16.msra.mxu0 %v4591_v50 }
 0x475   :  { %3964 = vmatprep.subr.bf16.mxu0 %v4396_v0 }
 0x4ea   :  { %v1103_v59 = vpop.f32.mrb[14].mxu0 }
 0x4eb   :  { %v1107_v61 = vadd.f32 %v1103_v59, %v233_v56  ;;  %v3033_v2 = vpop.f32.mrb[15].mxu0 }
 0x4ed   :  { %4206 = vtanh.f32 %v1107_v61  ;;  %v2155_v61 = vld [vmem:[%s5123_s8] ss:$0 sm:$0xff] }
 0x4f7   :  { %v4207_v3 = vpop.eup %4206 }
 0x4f8   :  { %3137 = vmatmul.mubr.f32.vlgmr.msra.gmra.mrb[8].mxu1 %v4207_v3 }
 0x4f9   :  { %3894 = vmatpush3.bf16.msra.mxu1 %v4595_v54  ;;  %3171 = vmatprep.mubr.msk.f32.mxu1 %vm4397_vm0, %v4398_v1 }
 0x4fa   :  { %3895 = vmatprep.subr.bf16.mxu1 %v4396_v0 }
 0x4fd   :  { %3897 = vmatpush3.bf16.msra.mxu1 %v4602_v57 }
 0x4fe   :  { %3898 = vmatprep.subr.bf16.mxu1 %v4396_v0 }
 0x501   :  { %3900 = vmatpush3.bf16.msra.mxu1 %v4610_v60 }
 0x502   :  { %3901 = vmatprep.subr.bf16.mxu1 %v4396_v0 }
 0x505   :  { %3903 = vmatpush3.bf16.msra.mxu1 %v4616_v63 }
 0x506   :  { %3904 = vmatprep.subr.bf16.mxu1 %v4396_v0 }
 0x509   :  { %3906 = vmatpush3.bf16.msra.mxu1 %v4632_v4 }
 0x50a   :  { %3907 = vmatprep.subr.bf16.mxu1 %v4396_v0 }
 0x50d   :  { %3909 = vmatpush3.bf16.msra.mxu1 %v4636_v10 }
 0x50e   :  { %3910 = vmatprep.subr.bf16.mxu1 %v4396_v0 }
 0x511   :  { %3912 = vmatpush3.bf16.msra.mxu1 %v4640_v17 }
 0x512   :  { %3913 = vmatprep.subr.bf16.mxu1 %v4396_v0 }
 0x515   :  { %3915 = vmatpush3.bf16.msra.mxu1 %v4643_v22 }
 0x516   :  { %3916 = vmatprep.subr.bf16.mxu1 %v4396_v0 }
 0x518   :  { %3172 = vmatmul.mubr.f32.vlgmr.msra.gmra.mrb[10].mxu1 %v4207_v3 }
 0x519   :  { %3918 = vmatpush3.bf16.msra.mxu1 %v4658_v33  ;;  %3206 = vmatprep.mubr.msk.f32.mxu1 %vm4397_vm0, %v4398_v1 }
 0x51a   :  { %3919 = vmatprep.subr.bf16.mxu1 %v4396_v0 }
 0x51d   :  { %3921 = vmatpush3.bf16.msra.mxu1 %v4661_v38 }
 0x51e   :  { %3922 = vmatprep.subr.bf16.mxu1 %v4396_v0 }
 0x521   :  { %3924 = vmatpush3.bf16.msra.mxu1 %v4671_v42 }
 0x522   :  { %3925 = vmatprep.subr.bf16.mxu1 %v4396_v0 }
 0x525   :  { %3927 = vmatpush3.bf16.msra.mxu1 %v4677_v45 }
 0x526   :  { %3928 = vmatprep.subr.bf16.mxu1 %v4396_v0 }
 0x529   :  { %3930 = vmatpush3.bf16.msra.mxu1 %v4683_v49 }
 0x52a   :  { %v1245_v6 = vpop.f32.mrb[16].mxu0  ;;  %3931 = vmatprep.subr.bf16.mxu1 %v4396_v0 }
 0x52b   :  { %v4159_v11 = vadd.f32 %v4773_v20, %v1245_v6  ;;  %v3103_v12 = vpop.f32.mrb[17].mxu0 }
 0x52d   :  { %4208 = vtanh.f32 %v4159_v11  ;;  %3933 = vmatpush3.bf16.msra.mxu1 %v4689_v53 }
 0x52e   :  { %3934 = vmatprep.subr.bf16.mxu1 %v4396_v0 }
 0x531   :  { %3936 = vmatpush3.bf16.msra.mxu1 %v4695_v58 }
 0x532   :  { %3937 = vmatprep.subr.bf16.mxu1 %v4396_v0 }
 0x535   :  { %3939 = vmatpush3.bf16.msra.mxu1 %v4701_v62 }
 0x536   :  { %4012 = vmatprep.subr.bf16.mxu1 %v4396_v0 }
 0x537   :  { %v4209_v13 = vpop.eup %4208 }
 0x538   :  { %3207 = vmatmul.mubr.f32.vlgmr.msra.gmra.mrb[10].mxu1 %v4209_v13 }
 0x539   :  { %4014 = vmatpush3.bf16.msra.mxu1 %v4564_v9  ;;  %3346 = vmatprep.mubr.msk.f32.mxu1 %vm4397_vm0, %v4398_v1  ;;  %v238_v9 = vadd.f32 %v4733_v5, %v4653_v23 }
 0x53a   :  { %4015 = vmatprep.subr.bf16.mxu1 %v4396_v0 }
 0x53d   :  { %4017 = vmatpush3.bf16.msra.mxu1 %v4567_v15 }
 0x53e   :  { %4018 = vmatprep.subr.bf16.mxu1 %v4396_v0 }
 0x541   :  { %4020 = vmatpush3.bf16.msra.mxu1 %v4571_v21 }
 0x542   :  { %4021 = vmatprep.subr.bf16.mxu1 %v4396_v0 }
 0x545   :  { %4023 = vmatpush3.bf16.msra.mxu1 %v4575_v28 }
 0x546   :  { %4024 = vmatprep.subr.bf16.mxu1 %v4396_v0 }
 0x549   :  { %4026 = vmatpush3.bf16.msra.mxu1 %v4579_v34 }
 0x54a   :  { %4027 = vmatprep.subr.bf16.mxu1 %v4396_v0 }
 0x54d   :  { %4029 = vmatpush3.bf16.msra.mxu1 %v4583_v40 }
 0x54e   :  { %4030 = vmatprep.subr.bf16.mxu1 %v4396_v0 }
 0x551   :  { %4032 = vmatpush3.bf16.msra.mxu1 %v4587_v46 }
 0x552   :  { %4033 = vmatprep.subr.bf16.mxu1 %v4396_v0 }
 0x555   :  { %4035 = vmatpush3.bf16.msra.mxu1 %v4591_v50 }
 0x556   :  { %4036 = vmatprep.subr.bf16.mxu1 %v4396_v0 }
 0x5cb   :  { %v1319_v15 = vpop.f32.mrb[8].mxu1 }
 0x5cc   :  { %v1323_v21 = vadd.f32 %v1319_v15, %v238_v9  ;;  %v3138_v28 = vpop.f32.mrb[9].mxu1 }
 0x5ce   :  { %4210 = vtanh.f32 %v1323_v21 }
 0x5d8   :  { %v4211_v34 = vpop.eup %4210 }
 0x5d9   :  { %3242 = vmatmul.mubr.f32.vlgmr.msra.gmra.mrb[18].mxu0 %v4211_v34 }
 0x5da   :  { %3966 = vmatpush3.bf16.msra.mxu0 %v4595_v54  ;;  %3276 = vmatprep.mubr.msk.f32.mxu0 %vm4397_vm0, %v4398_v1 }
 0x5db   :  { %3967 = vmatprep.subr.bf16.mxu0 %v4396_v0 }
 0x5de   :  { %3969 = vmatpush3.bf16.msra.mxu0 %v4602_v57 }
 0x5df   :  { %3970 = vmatprep.subr.bf16.mxu0 %v4396_v0 }
 0x5e2   :  { %3972 = vmatpush3.bf16.msra.mxu0 %v4610_v60 }
 0x5e3   :  { %3973 = vmatprep.subr.bf16.mxu0 %v4396_v0 }
 0x5e6   :  { %3975 = vmatpush3.bf16.msra.mxu0 %v4616_v63 }
 0x5e7   :  { %3976 = vmatprep.subr.bf16.mxu0 %v4396_v0 }
 0x5ea   :  { %3978 = vmatpush3.bf16.msra.mxu0 %v4632_v4 }
 0x5eb   :  { %3979 = vmatprep.subr.bf16.mxu0 %v4396_v0 }
 0x5ee   :  { %3981 = vmatpush3.bf16.msra.mxu0 %v4636_v10 }
 0x5ef   :  { %3982 = vmatprep.subr.bf16.mxu0 %v4396_v0 }
 0x5f2   :  { %3984 = vmatpush3.bf16.msra.mxu0 %v4640_v17 }
 0x5f3   :  { %3985 = vmatprep.subr.bf16.mxu0 %v4396_v0 }
 0x5f6   :  { %3987 = vmatpush3.bf16.msra.mxu0 %v4643_v22 }
 0x5f7   :  { %3988 = vmatprep.subr.bf16.mxu0 %v4396_v0 }
 0x5f9   :  { %3277 = vmatmul.mubr.f32.vlgmr.msra.gmra.mrb[20].mxu0 %v4211_v34 }
 0x5fa   :  { %3990 = vmatpush3.bf16.msra.mxu0 %v4658_v33  ;;  %3311 = vmatprep.mubr.msk.f32.mxu0 %vm4397_vm0, %v4398_v1 }
 0x5fb   :  { %3991 = vmatprep.subr.bf16.mxu0 %v4396_v0 }
 0x5fe   :  { %3993 = vmatpush3.bf16.msra.mxu0 %v4661_v38 }
 0x5ff   :  { %3994 = vmatprep.subr.bf16.mxu0 %v4396_v0 }
 0x602   :  { %3996 = vmatpush3.bf16.msra.mxu0 %v4671_v42 }
 0x603   :  { %3997 = vmatprep.subr.bf16.mxu0 %v4396_v0 }
 0x606   :  { %3999 = vmatpush3.bf16.msra.mxu0 %v4677_v45 }
 0x607   :  { %4000 = vmatprep.subr.bf16.mxu0 %v4396_v0 }
 0x60a   :  { %4002 = vmatpush3.bf16.msra.mxu0 %v4683_v49 }
 0x60b   :  { %v1461_v40 = vpop.f32.mrb[10].mxu1  ;;  %4003 = vmatprep.subr.bf16.mxu0 %v4396_v0 }
 0x60c   :  { %v4160_v46 = vadd.f32 %v4773_v20, %v1461_v40  ;;  %v3208_v50 = vpop.f32.mrb[11].mxu1 }
 0x60e   :  { %4212 = vtanh.f32 %v4160_v46  ;;  %4005 = vmatpush3.bf16.msra.mxu0 %v4689_v53 }
 0x60f   :  { %4006 = vmatprep.subr.bf16.mxu0 %v4396_v0 }
 0x612   :  { %4008 = vmatpush3.bf16.msra.mxu0 %v4695_v58 }
 0x613   :  { %4009 = vmatprep.subr.bf16.mxu0 %v4396_v0 }
 0x616   :  { %4011 = vmatpush3.bf16.msra.mxu0 %v4701_v62 }
 0x617   :  { %4084 = vmatprep.subr.bf16.mxu0 %v4396_v0 }
 0x618   :  { %v4213_v5 = vpop.eup %4212 }
 0x619   :  { %3312 = vmatmul.mubr.f32.vlgmr.msra.gmra.mrb[20].mxu0 %v4213_v5 }
 0x61a   :  { %4086 = vmatpush3.bf16.msra.mxu0 %v4595_v54  ;;  %3451 = vmatprep.mubr.msk.f32.mxu0 %vm4397_vm0, %v4398_v1 }
 0x61b   :  { %4087 = vmatprep.subr.bf16.mxu0 %v4396_v0 }
 0x61e   :  { %4089 = vmatpush3.bf16.msra.mxu0 %v4602_v57 }
 0x61f   :  { %4090 = vmatprep.subr.bf16.mxu0 %v4396_v0 }
 0x622   :  { %4092 = vmatpush3.bf16.msra.mxu0 %v4610_v60 }
 0x623   :  { %4093 = vmatprep.subr.bf16.mxu0 %v4396_v0 }
 0x626   :  { %4095 = vmatpush3.bf16.msra.mxu0 %v4616_v63 }
 0x627   :  { %4096 = vmatprep.subr.bf16.mxu0 %v4396_v0 }
 0x62a   :  { %4098 = vmatpush3.bf16.msra.mxu0 %v4632_v4 }
 0x62b   :  { %4099 = vmatprep.subr.bf16.mxu0 %v4396_v0 }
 0x62e   :  { %4101 = vmatpush3.bf16.msra.mxu0 %v4636_v10 }
 0x62f   :  { %4102 = vmatprep.subr.bf16.mxu0 %v4396_v0 }
 0x632   :  { %4104 = vmatpush3.bf16.msra.mxu0 %v4640_v17 }
 0x633   :  { %4105 = vmatprep.subr.bf16.mxu0 %v4396_v0 }
 0x636   :  { %4107 = vmatpush3.bf16.msra.mxu0 %v4643_v22 }
 0x637   :  { %4108 = vmatprep.subr.bf16.mxu0 %v4396_v0 }
 0x6ac   :  { %v1535_v16 = vpop.f32.mrb[18].mxu0 }
 0x6ad   :  { %v1539_v18 = vadd.f32 %v1535_v16, %v243_v14  ;;  %v3243_v19 = vpop.f32.mrb[19].mxu0 }
 0x6af   :  { %4214 = vtanh.f32 %v1539_v18 }
 0x6b9   :  { %v4215_v24 = vpop.eup %4214 }
 0x6ba   :  { %3347 = vmatmul.mubr.f32.vlgmr.msra.gmra.mrb[12].mxu1 %v4215_v24 }
 0x6bb   :  { %4038 = vmatpush3.bf16.msra.mxu1 %v4595_v54  ;;  %3381 = vmatprep.mubr.msk.f32.mxu1 %vm4397_vm0, %v4398_v1 }
 0x6bc   :  { %4039 = vmatprep.subr.bf16.mxu1 %v4396_v0 }
 0x6bf   :  { %4041 = vmatpush3.bf16.msra.mxu1 %v4602_v57 }
 0x6c0   :  { %4042 = vmatprep.subr.bf16.mxu1 %v4396_v0 }
 0x6c3   :  { %4044 = vmatpush3.bf16.msra.mxu1 %v4610_v60 }
 0x6c4   :  { %4045 = vmatprep.subr.bf16.mxu1 %v4396_v0 }
 0x6c7   :  { %4047 = vmatpush3.bf16.msra.mxu1 %v4616_v63 }
 0x6c8   :  { %4048 = vmatprep.subr.bf16.mxu1 %v4396_v0 }
 0x6cb   :  { %4050 = vmatpush3.bf16.msra.mxu1 %v4632_v4  ;;  %v2041_v4 = vld [vmem:[#allocation12] sm:$0xff] }
 0x6cc   :  { %4051 = vmatprep.subr.bf16.mxu1 %v4396_v0 }
 0x6cf   :  { %4053 = vmatpush3.bf16.msra.mxu1 %v4636_v10  ;;  %v2042_v10 = vld [vmem:[#allocation12 + $0x8] sm:$0xff] }
 0x6d0   :  { %4054 = vmatprep.subr.bf16.mxu1 %v4396_v0 }
 0x6d3   :  { %4056 = vmatpush3.bf16.msra.mxu1 %v4640_v17  ;;  %v2043_v17 = vld [vmem:[#allocation12 + $0x10] sm:$0xff] }
 0x6d4   :  { %4057 = vmatprep.subr.bf16.mxu1 %v4396_v0  ;;  %v4136_v25 = vpack.c.bf16 %v2044_v8, %v2043_v17 }
 0x6d7   :  { %4059 = vmatpush3.bf16.msra.mxu1 %v4643_v22  ;;  %v4133_v22 = vpack.c.bf16 %v2042_v10, %v2041_v4 }
 0x6d8   :  { %4060 = vmatprep.subr.bf16.mxu1 %v4396_v0 }
 0x6da   :  { %3382 = vmatmul.mubr.f32.vlgmr.msra.gmra.mrb[14].mxu1 %v4215_v24 }
 0x6db   :  { %4062 = vmatpush3.bf16.msra.mxu1 %v4658_v33  ;;  %3416 = vmatprep.mubr.msk.f32.mxu1 %vm4397_vm0, %v4398_v1 }
 0x6dc   :  { %4063 = vmatprep.subr.bf16.mxu1 %v4396_v0 }
 0x6df   :  { %4065 = vmatpush3.bf16.msra.mxu1 %v4661_v38 }
 0x6e0   :  { %4066 = vmatprep.subr.bf16.mxu1 %v4396_v0 }
 0x6e3   :  { %4068 = vmatpush3.bf16.msra.mxu1 %v4671_v42 }
 0x6e4   :  { %4069 = vmatprep.subr.bf16.mxu1 %v4396_v0 }
 0x6e7   :  { %4071 = vmatpush3.bf16.msra.mxu1 %v4677_v45 }
 0x6e8   :  { %4072 = vmatprep.subr.bf16.mxu1 %v4396_v0 }
 0x6eb   :  { %4074 = vmatpush3.bf16.msra.mxu1 %v4683_v49 }
 0x6ec   :  { %v1677_v54 = vpop.f32.mrb[20].mxu0  ;;  %4075 = vmatprep.subr.bf16.mxu1 %v4396_v0 }
 0x6ed   :  { %v4161_v57 = vadd.f32 %v4773_v20, %v1677_v54  ;;  %v3313_v60 = vpop.f32.mrb[21].mxu0 }
 0x6ef   :  { %4216 = vtanh.f32 %v4161_v57  ;;  %4077 = vmatpush3.bf16.msra.mxu1 %v4689_v53 }
 0x6f0   :  { %4078 = vmatprep.subr.bf16.mxu1 %v4396_v0 }
 0x6f3   :  { %4080 = vmatpush3.bf16.msra.mxu1 %v4695_v58 }
 0x6f4   :  { %4081 = vmatprep.subr.bf16.mxu1 %v4396_v0 }
 0x6f7   :  { %4083 = vmatpush3.bf16.msra.mxu1 %v4701_v62 }
 0x6f8   :  { %4132 = vmatprep.subr.bf16.mxu1 %v4396_v0 }
 0x6f9   :  { %v4217_v63 = vpop.eup %4216 }
 0x6fa   :  { %3417 = vmatmul.mubr.f32.vlgmr.msra.gmra.mrb[14].mxu1 %v4217_v63 }
 0x6fb   :  { %3521 = vmatprep.mubr.msk.f32.mxu1 %vm4397_vm0, %v4398_v1  ;;  %4134 = vmatpush3.bf16.msra.mxu1 %v4133_v22 }
 0x6fc   :  { %4135 = vmatprep.subr.bf16.mxu1 %v4396_v0 }
 0x6ff   :  { %4137 = vmatpush3.bf16.msra.mxu1 %v4136_v25 }
 0x700   :  { %4138 = vmatprep.subr.bf16.mxu1 %v4396_v0 }
 0x703   :  { %4140 = vmatpush3.bf16.msra.mxu1 %v4139_v29 }
 0x704   :  { %4141 = vmatprep.subr.bf16.mxu1 %v4396_v0 }
 0x707   :  { %4143 = vmatpush3.bf16.msra.mxu1 %v4142_v32 }
 0x708   :  { %4144 = vmatprep.subr.bf16.mxu1 %v4396_v0 }
 0x70b   :  { %4146 = vmatpush3.bf16.msra.mxu1 %v4145_v37 }
 0x70c   :  { %4147 = vmatprep.subr.bf16.mxu1 %v4396_v0 }
 0x78d   :  { %v1751_v41 = vpop.f32.mrb[12].mxu1 }
 0x78e   :  { %v1755_v43 = vadd.f32 %v1751_v41, %v248_v39  ;;  %v3348_v44 = vpop.f32.mrb[13].mxu1 }
 0x790   :  { %4218 = vtanh.f32 %v1755_v43 }
 0x79a   :  { %v4219_v47 = vpop.eup %4218 }
 0x79b   :  { %3452 = vmatmul.mubr.f32.vlgmr.msra.gmra.mrb[22].mxu0 %v4219_v47 }
 0x79c   :  { %4110 = vmatpush3.bf16.msra.mxu0 %v4658_v33  ;;  %3486 = vmatprep.mubr.msk.f32.mxu0 %vm4397_vm0, %v4398_v1 }
 0x79d   :  { %4111 = vmatprep.subr.bf16.mxu0 %v4396_v0 }
 0x7a0   :  { %4113 = vmatpush3.bf16.msra.mxu0 %v4661_v38 }
 0x7a1   :  { %4114 = vmatprep.subr.bf16.mxu0 %v4396_v0 }
 0x7a4   :  { %4116 = vmatpush3.bf16.msra.mxu0 %v4671_v42  ;;  %v2051_v42 = vld [vmem:[#allocation12 + $0x50] sm:$0xff] }
 0x7a5   :  { %4117 = vmatprep.subr.bf16.mxu0 %v4396_v0 }
 0x7a8   :  { %4119 = vmatpush3.bf16.msra.mxu0 %v4677_v45  ;;  %v2052_v45 = vld [vmem:[#allocation12 + $0x58] sm:$0xff] }
 0x7a9   :  { %4120 = vmatprep.subr.bf16.mxu0 %v4396_v0 }
 0x7ac   :  { %4122 = vmatpush3.bf16.msra.mxu0 %v4683_v49  ;;  %v4148_v49 = vpack.c.bf16 %v2052_v45, %v2051_v42 }
 0x7ad   :  { %4123 = vmatprep.subr.bf16.mxu0 %v4396_v0 }
 0x7ae   :  { %4149 = vmatpush3.bf16.msra.mxu1 %v4148_v49 }
 0x7af   :  { %4150 = vmatprep.subr.bf16.mxu1 %v4396_v0 }
 0x7b0   :  { %4125 = vmatpush3.bf16.msra.mxu0 %v4689_v53  ;;  %v2053_v53 = vld [vmem:[#allocation12 + $0x60] sm:$0xff] }
 0x7b1   :  { %4126 = vmatprep.subr.bf16.mxu0 %v4396_v0 }
 0x7b4   :  { %4128 = vmatpush3.bf16.msra.mxu0 %v4695_v58  ;;  %v4151_v58 = vpack.c.bf16 %v2054_v7, %v2053_v53 }
 0x7b5   :  { %4129 = vmatprep.subr.bf16.mxu0 %v4396_v0 }
 0x7b6   :  { %4152 = vmatpush3.bf16.msra.mxu1 %v4151_v58 }
 0x7b7   :  { %4153 = vmatprep.subr.bf16.mxu1 %v4396_v0 }
 0x7b8   :  { %4131 = vmatpush3.bf16.msra.mxu0 %v4701_v62  ;;  %v4154_v62 = vpack.c.bf16 %v2056_v51, %v2055_v48 }
 0x7ba   :  { %4155 = vmatpush3.bf16.msra.mxu1 %v4154_v62 }
 0x7cd   :  { %v1893_v1 = vpop.f32.mrb[14].mxu1 }
 0x7ce   :  { %v4162_v23 = vadd.f32 %v4773_v20, %v1893_v1  ;;  %v3418_v33 = vpop.f32.mrb[15].mxu1 }
 0x7d0   :  { %4220 = vtanh.f32 %v4162_v23 }
 0x7da   :  { %v4221_v38 = vpop.eup %4220 }
 0x7db   :  { %3487 = vmatmul.mubr.f32.vlgmr.msra.gmra.mrb[22].mxu0 %v4221_v38 }
 0x8ae   :  { %v2035_v52 = vpop.f32.mrb[22].mxu0 }
 0x8af   :  { %v4163_v55 = vadd.f32 %v4773_v20, %v2035_v52  ;;  %v3488_v56 = vpop.f32.mrb[23].mxu0 }
 0x8b1   :  { %4222 = vtanh.f32 %v4163_v55 }
 0x8bb   :  { %v4223_v59 = vpop.eup %4222 }
 0x8bc   :  { %3522 = vmatmul.mubr.f32.vlgmr.msra.gmra.mrb[16].mxu1 %v4223_v59 }
 0x98f   :  { %v2130_v2 = vpop.f32.mrb[16].mxu1 }
 0x990   :  { %v2131_v3 = vadd.f32 %v2155_v61, %v2130_v2  ;;  %v3523_v6 = vpop.f32.mrb[17].mxu1 }
 0x992   :  { %2134 = vst [vmem:[#allocation14] sm:$0xff] %v2131_v3 }
 0x993   :  { %4367 = shalt.err (!%p4364_p10)
}
 0x994   :  { %s4368_s25 = scalar_lea.hbm %s5124_s9, 128 }
 0x995   :  { %p4369_p11 = scmp.ne.s32.totalorder %s5124_s9, %s4368_s25  ;;  %p4372_p12 = scmp.lt.u32.totalorder %s4368_s25, %s5124_s9 }
 0x997   :  { %p4374_p13 = pnand %p4372_p12, %p4369_p11 }
 0x999   :  { %4377 = shalt.err (!%p4374_p13)
}
 0x99a   :  { %2144 = dma.vmem_to_hbm [thread:$0]  %s2142_s19, 128, %s5124_s9, [#allocation5]  }
 0x99b   :  { %4386 = dma.done.wait [#allocation5], 128  }
 0x99c   :  { %4387 = vsyncadd [#allocation5], 4294967168 }
 0x99d   :  { %2148 = vsyncpa [#allocation4], 1 }
 0x99e   :  { %2149 = vsyncpa [#allocation7], 1 }
 0x99f   :  { %2150 = vsyncpa [#allocation10], 1 }
 0x9a0   :  { %2151 = vsyncpa [#allocation13], 1 }
 0x9a1   :  { %2152 = vsyncpa [#allocation5], 1 }

</bundles_post_ra>
